<compile_context>
chip_gen: v7x
topology: tpu7x:2x2x1
jax: 0.10.0
libtpu: 0.0.40
codegen_flags: <defaults>
</compile_context>

<pallas_src>
import math
from functools import partial

import numpy as np
import jax
import jax.numpy as jnp
from jax.experimental import pallas as pl
from jax.experimental.pallas import tpu as pltpu


def _gat_kernel(x_ref, adj_ref, wqkv_ref, bqkv_ref, wo_ref, bo_ref, o_ref, *,
                batch_block, nodes, num_heads, head_dim):
    """One grid step: attention + output projection for `batch_block` batches.

    x_ref:    (bb, N, F)     adj_ref:  (N, N)
    wqkv_ref: (F, 3*HD)      bqkv_ref: (1, 3*HD)
    wo_ref:   (HD, E)        bo_ref:   (1, E)
    o_ref:    (bb, N, E)     with HD = num_heads * head_dim, E = head_dim.
    """
    f = x_ref.shape[-1]
    HD = num_heads * head_dim
    BN = batch_block * nodes

    # Fused QKV projection: one MXU matmul + one bias add for the whole block.
    # (1/sqrt(D) is already folded into the Wq/bq columns by prepare_params.)
    x = x_ref[...].reshape(BN, f)                                      # (bb*N, F)
    qkv = jnp.dot(x, wqkv_ref[...],
                  preferred_element_type=jnp.float32) + bqkv_ref[...]  # (bb*N, 3*HD)

    # Additive attention mask (masked_fill(adj == 0, -inf)), computed and
    # broadcast once.  Rows with no edge give NaN after softmax, matching the
    # PyTorch module; valid graph inputs carry self-loops.
    mask = jnp.where(adj_ref[...] == 0.0, -jnp.inf, 0.0)               # (N, N)
    mask = jnp.broadcast_to(mask, (batch_block, nodes, nodes))         # hoisted

    wo = wo_ref[...]                                                   # (HD, E)

    # Per-head attention, batched over the batch axis.  num_heads == 4, so
    # this is a tiny static unroll of batched dot_general regions.
    acc = None
    for h in range(num_heads):
        c = h * head_dim
        qh = qkv[:, c:c + head_dim].reshape(batch_block, nodes, head_dim)
        kh = qkv[:, HD + c:HD + c + head_dim].reshape(batch_block, nodes, head_dim)
        vh = qkv[:, 2 * HD + c:2 * HD + c + head_dim].reshape(batch_block, nodes, head_dim)

        # Scores via contraction over the last axes (no explicit transpose).
        s = jnp.einsum('bnd,bmd->bnm', qh, kh,
                       preferred_element_type=jnp.float32) + mask      # (bb, N, N)
        m = jnp.max(s, axis=-1, keepdims=True)
        p = jnp.exp(s - m)
        w = p * pl.reciprocal(jnp.sum(p, axis=-1, keepdims=True), approx=False)
        oh = jnp.einsum('bnm,bmd->bnd', w, vh,
                        preferred_element_type=jnp.float32)            # (bb, N, D)

        # Fused output projection: accumulate this head's contribution.
        contrib = jnp.dot(oh.reshape(BN, head_dim), wo[c:c + head_dim, :],
                          preferred_element_type=jnp.float32)          # (bb*N, E)
        acc = contrib if acc is None else acc + contrib

    out = acc + bo_ref[...]
    o_ref[...] = out.reshape(batch_block, nodes, head_dim).astype(o_ref.dtype)


def prepare_params(params, *, num_heads, out_features):
    """Fuse Q/K/V weights + biases and fold the 1/sqrt(D) score scale into
    Wq/bq.  Call once; the result feeds every forward call."""
    del num_heads  # shapes already carry num_heads * out_features
    scale = 1.0 / math.sqrt(out_features)
    wqkv = jnp.concatenate([params["wq"] * scale, params["wk"], params["wv"]], axis=1)
    bqkv = jnp.concatenate([params["bq"] * scale, params["bk"], params["bv"]], axis=1)
    return {"wqkv": wqkv, "bqkv": bqkv, "wo": params["wo"], "bo": params["bo"]}


@partial(jax.jit, static_argnames=("num_heads", "out_features", "batch_block"))
def missing_gat_forward(x, edge_index, fused, *, num_heads, out_features,
                        batch_block=None):
    """x: (B, N, F); edge_index: (2, E) int32; fused: output of prepare_params.
    Weights are pre-transposed so y = x @ W + b."""
    B, N, F = x.shape
    if N != B:
        # The module builds a (B, B) adjacency broadcast over the (q, k) node
        # axes, which requires N == B.
        raise ValueError(f"MissingGAT requires N == B (got B={B}, N={N}).")
    HD = num_heads * out_features
    bb = B if batch_block is None else batch_block
    if B % bb != 0:
        raise ValueError("batch_block must divide the batch size.")

    # Adjacency scatter exactly as in the PyTorch forward (tiny; plain JAX).
    adj = jnp.zeros((B, B), jnp.float32).at[edge_index[0], edge_index[1]].set(1.0)

    kernel = partial(_gat_kernel, batch_block=bb, nodes=N,
                     num_heads=num_heads, head_dim=out_features)
    fixed2d = lambda i: (0, 0)

    out = pl.pallas_call(
        kernel,
        out_shape=jax.ShapeDtypeStruct((B, N, out_features), jnp.float32),
        grid=(B // bb,),
        in_specs=[
            pl.BlockSpec((bb, N, F), lambda i: (i, 0, 0)),        # x, batch tile
            pl.BlockSpec((N, N), fixed2d),                        # adjacency
            pl.BlockSpec((F, 3 * HD), fixed2d),                   # fused Wqkv
            pl.BlockSpec((1, 3 * HD), fixed2d),                   # fused bqkv
            pl.BlockSpec((HD, out_features), fixed2d),            # Wo
            pl.BlockSpec((1, out_features), fixed2d),             # bo
        ],
        out_specs=pl.BlockSpec((bb, N, out_features), lambda i: (i, 0, 0)),
        compiler_params=pltpu.CompilerParams(dimension_semantics=("parallel",)),
    )(x, adj, fused["wqkv"], fused["bqkv"], fused["wo"], fused["bo"])
    return out


def ref_forward(x, edge_index, params, *, num_heads, out_features):
    """Pure-JAX reference mirroring the PyTorch forward."""
    B, N, _ = x.shape
    adj = jnp.zeros((B, B), jnp.float32).at[edge_index[0], edge_index[1]].set(1.0)
    q = (x @ params["wq"] + params["bq"]).reshape(B, N, num_heads, out_features)
    k = (x @ params["wk"] + params["bk"]).reshape(B, N, num_heads, out_features)
    v = (x @ params["wv"] + params["bv"]).reshape(B, N, num_heads, out_features)
    s = jnp.einsum('bqhd,bkhd->bhqk', q, k) / out_features ** 0.5
    s = jnp.where(adj[None, None] == 0, -jnp.inf, s)
    w = jax.nn.softmax(s, axis=-1)
    o = jnp.einsum('bhqk,bkhd->bqhd', w, v).reshape(B, N, num_heads * out_features)
    return o @ params["wo"] + params["bo"]


if __name__ == "__main__":
    # Small shapes consistent with the module: the adjacency is (B, B) and is
    # broadcast over the (q, k) node axes, so N must equal B.
    B = N = 8
    in_features = 16
    out_features = 8
    num_heads = 4
    HD = num_heads * out_features

    key = jax.random.PRNGKey(0)
    kx, kq, kk, kv, ko, kbq, kbk, kbv, kbo = jax.random.split(key, 9)

    x = jax.random.normal(kx, (B, N, in_features), dtype=jnp.float32)

    # Deterministic parameter init (shapes from nn.Linear in __init__),
    # stored pre-transposed as (in_features, out_features).
    params = {
        "wq": 0.1 * jax.random.normal(kq, (in_features, HD), dtype=jnp.float32),
        "bq": 0.1 * jax.random.normal(kbq, (1, HD), dtype=jnp.float32),
        "wk": 0.1 * jax.random.normal(kk, (in_features, HD), dtype=jnp.float32),
        "bk": 0.1 * jax.random.normal(kbk, (1, HD), dtype=jnp.float32),
        "wv": 0.1 * jax.random.normal(kv, (in_features, HD), dtype=jnp.float32),
        "bv": 0.1 * jax.random.normal(kbv, (1, HD), dtype=jnp.float32),
        "wo": 0.1 * jax.random.normal(ko, (HD, out_features), dtype=jnp.float32),
        "bo": 0.1 * jax.random.normal(kbo, (1, out_features), dtype=jnp.float32),
    }

    # edge_index: self-loops + ring edges (every row of adj has >= 1 edge, so
    # no all -inf softmax rows, matching a valid graph input).
    src = jnp.concatenate([jnp.arange(B), jnp.arange(B)]).astype(jnp.int32)
    dst = jnp.concatenate([jnp.arange(B), (jnp.arange(B) + 1) % B]).astype(jnp.int32)
    edge_index = jnp.stack([src, dst])

    # One-time weight fusion + scale fold (outside the per-call path).
    fused = prepare_params(params, num_heads=num_heads, out_features=out_features)

    out = missing_gat_forward(x, edge_index, fused,
                              num_heads=num_heads, out_features=out_features)
    out = jax.block_until_ready(out)

    expected = ref_forward(x, edge_index, params,
                           num_heads=num_heads, out_features=out_features)
    np.testing.assert_allclose(np.asarray(out), np.asarray(expected),
                               rtol=1e-5, atol=1e-5)

    print("KERNEL_OK")
</pallas_src>

<mosaic_0001>
module attributes {stable_mosaic.version = 11 : i64} {
  func.func @_gat_kernel(%arg0: i32, %arg1: memref<8x8x16xf32, #tpu.memory_space<vmem>>, %arg2: memref<8x8xf32, #tpu.memory_space<vmem>>, %arg3: memref<16x96xf32, #tpu.memory_space<vmem>>, %arg4: memref<1x96xf32, #tpu.memory_space<vmem>>, %arg5: memref<32x8xf32, #tpu.memory_space<vmem>>, %arg6: memref<1x8xf32, #tpu.memory_space<vmem>>, %arg7: memref<8x8x8xf32, #tpu.memory_space<vmem>>) attributes {dimension_semantics = [#tpu.dimension_semantics<parallel>], iteration_bounds = array<i64: 1>, scalar_prefetch = 0 : i64, scratch_operands = 0 : i64, tpu.core_type = #tpu.core_type<tc>, window_params = [{transform_indices = @transform_0, window_bounds = array<i64: 8, 8, 16>}, {pipeline_mode = #tpu.pipeline_mode<synchronous>, transform_indices = @transform_1, window_bounds = array<i64: 8, 8>}, {pipeline_mode = #tpu.pipeline_mode<synchronous>, transform_indices = @transform_2, window_bounds = array<i64: 16, 96>}, {pipeline_mode = #tpu.pipeline_mode<synchronous>, transform_indices = @transform_3, window_bounds = array<i64: 1, 96>}, {pipeline_mode = #tpu.pipeline_mode<synchronous>, transform_indices = @transform_4, window_bounds = array<i64: 32, 8>}, {pipeline_mode = #tpu.pipeline_mode<synchronous>, transform_indices = @transform_5, window_bounds = array<i64: 1, 8>}, {transform_indices = @transform_6, window_bounds = array<i64: 8, 8, 8>}]} {
    %c0 = arith.constant 0 : index
    %c0_0 = arith.constant 0 : index
    %c0_1 = arith.constant 0 : index
    %0 = vector.load %arg1[%c0, %c0_0, %c0_1] : memref<8x8x16xf32, #tpu.memory_space<vmem>>, vector<8x8x16xf32>
    %1 = vector.shape_cast %0 : vector<8x8x16xf32> to vector<64x16xf32>
    %c0_2 = arith.constant 0 : index
    %c0_3 = arith.constant 0 : index
    %2 = vector.load %arg3[%c0_2, %c0_3] : memref<16x96xf32, #tpu.memory_space<vmem>>, vector<16x96xf32>
    %cst = arith.constant dense<0.000000e+00> : vector<64x96xf32>
    %3 = tpu.matmul %1, %2, %cst {dimension_numbers = #tpu.dot_dimension_numbers<[1], [0], [0], [1], [0, 0, 1, 1], [], []>} : vector<64x16xf32>, vector<16x96xf32>, vector<64x96xf32> -> vector<64x96xf32>
    %c0_4 = arith.constant 0 : index
    %c0_5 = arith.constant 0 : index
    %4 = vector.load %arg4[%c0_4, %c0_5] : memref<1x96xf32, #tpu.memory_space<vmem>>, vector<1x96xf32>
    %5 = vector.broadcast %4 : vector<1x96xf32> to vector<64x96xf32>
    %6 = arith.addf %3, %5 : vector<64x96xf32>
    %c0_6 = arith.constant 0 : index
    %c0_7 = arith.constant 0 : index
    %7 = vector.load %arg2[%c0_6, %c0_7] : memref<8x8xf32, #tpu.memory_space<vmem>>, vector<8x8xf32>
    %cst_8 = arith.constant 0.000000e+00 : f32
    %8 = vector.broadcast %cst_8 : f32 to vector<8x8xf32>
    %9 = arith.cmpf oeq, %7, %8 : vector<8x8xf32>
    %cst_9 = arith.constant 0xFF800000 : f32
    %cst_10 = arith.constant 0.000000e+00 : f32
    %10 = vector.broadcast %cst_9 : f32 to vector<8x8xf32>
    %11 = vector.broadcast %cst_10 : f32 to vector<8x8xf32>
    %12 = arith.select %9, %10, %11 : vector<8x8xi1>, vector<8x8xf32>
    %13 = vector.shape_cast %12 : vector<8x8xf32> to vector<1x8x8xf32>
    %14 = vector.broadcast %13 : vector<1x8x8xf32> to vector<8x8x8xf32>
    %c0_11 = arith.constant 0 : index
    %c0_12 = arith.constant 0 : index
    %15 = vector.load %arg5[%c0_11, %c0_12] : memref<32x8xf32, #tpu.memory_space<vmem>>, vector<32x8xf32>
    %16 = vector.extract_strided_slice %6 {offsets = [0, 0], sizes = [64, 8], strides = [1, 1]} : vector<64x96xf32> to vector<64x8xf32>
    %17 = vector.shape_cast %16 : vector<64x8xf32> to vector<8x8x8xf32>
    %18 = vector.extract_strided_slice %6 {offsets = [0, 32], sizes = [64, 8], strides = [1, 1]} : vector<64x96xf32> to vector<64x8xf32>
    %19 = vector.shape_cast %18 : vector<64x8xf32> to vector<8x8x8xf32>
    %20 = vector.extract_strided_slice %6 {offsets = [0, 64], sizes = [64, 8], strides = [1, 1]} : vector<64x96xf32> to vector<64x8xf32>
    %21 = vector.shape_cast %20 : vector<64x8xf32> to vector<8x8x8xf32>
    "tpu.trace_start"() <{level = 10 : i32, message = "bnd,bmd->bnm"}> : () -> ()
    %cst_13 = arith.constant dense<0.000000e+00> : vector<8x8x8xf32>
    %22 = tpu.matmul %17, %19, %cst_13 {dimension_numbers = #tpu.dot_dimension_numbers<[2], [2], [1], [1], [0, 0, 0, 1, 1, 1], [0], [0]>} : vector<8x8x8xf32>, vector<8x8x8xf32>, vector<8x8x8xf32> -> vector<8x8x8xf32>
    "tpu.trace_stop"() : () -> ()
    %23 = arith.addf %22, %14 : vector<8x8x8xf32>
    %cst_14 = arith.constant dense<0xFF800000> : vector<8x8xf32>
    %24 = vector.multi_reduction <maximumf>, %23, %cst_14 [2] : vector<8x8x8xf32> to vector<8x8xf32>
    %25 = vector.shape_cast %24 : vector<8x8xf32> to vector<8x8x1xf32>
    %26 = vector.broadcast %25 : vector<8x8x1xf32> to vector<8x8x8xf32>
    %27 = arith.subf %23, %26 : vector<8x8x8xf32>
    %28 = math.exp %27 : vector<8x8x8xf32>
    %cst_15 = arith.constant dense<0.000000e+00> : vector<8x8xf32>
    %29 = vector.multi_reduction <add>, %28, %cst_15 [2] : vector<8x8x8xf32> to vector<8x8xf32>
    %30 = vector.shape_cast %29 : vector<8x8xf32> to vector<8x8x1xf32>
    %31 = tpu.reciprocal %30 : vector<8x8x1xf32> -> vector<8x8x1xf32>
    %32 = vector.broadcast %31 : vector<8x8x1xf32> to vector<8x8x8xf32>
    %33 = arith.mulf %28, %32 : vector<8x8x8xf32>
    "tpu.trace_start"() <{level = 10 : i32, message = "bnm,bmd->bnd"}> : () -> ()
    %cst_16 = arith.constant dense<0.000000e+00> : vector<8x8x8xf32>
    %34 = tpu.matmul %33, %21, %cst_16 {dimension_numbers = #tpu.dot_dimension_numbers<[2], [1], [1], [2], [0, 0, 0, 1, 1, 2], [0], [0]>} : vector<8x8x8xf32>, vector<8x8x8xf32>, vector<8x8x8xf32> -> vector<8x8x8xf32>
    "tpu.trace_stop"() : () -> ()
    %35 = vector.shape_cast %34 : vector<8x8x8xf32> to vector<64x8xf32>
    %36 = vector.extract_strided_slice %15 {offsets = [0, 0], sizes = [8, 8], strides = [1, 1]} : vector<32x8xf32> to vector<8x8xf32>
    %cst_17 = arith.constant dense<0.000000e+00> : vector<64x8xf32>
    %37 = tpu.matmul %35, %36, %cst_17 {dimension_numbers = #tpu.dot_dimension_numbers<[1], [0], [0], [1], [0, 0, 1, 1], [], []>} : vector<64x8xf32>, vector<8x8xf32>, vector<64x8xf32> -> vector<64x8xf32>
    %38 = vector.extract_strided_slice %6 {offsets = [0, 8], sizes = [64, 8], strides = [1, 1]} : vector<64x96xf32> to vector<64x8xf32>
    %39 = vector.shape_cast %38 : vector<64x8xf32> to vector<8x8x8xf32>
    %40 = vector.extract_strided_slice %6 {offsets = [0, 40], sizes = [64, 8], strides = [1, 1]} : vector<64x96xf32> to vector<64x8xf32>
    %41 = vector.shape_cast %40 : vector<64x8xf32> to vector<8x8x8xf32>
    %42 = vector.extract_strided_slice %6 {offsets = [0, 72], sizes = [64, 8], strides = [1, 1]} : vector<64x96xf32> to vector<64x8xf32>
    %43 = vector.shape_cast %42 : vector<64x8xf32> to vector<8x8x8xf32>
    "tpu.trace_start"() <{level = 10 : i32, message = "bnd,bmd->bnm"}> : () -> ()
    %cst_18 = arith.constant dense<0.000000e+00> : vector<8x8x8xf32>
    %44 = tpu.matmul %39, %41, %cst_18 {dimension_numbers = #tpu.dot_dimension_numbers<[2], [2], [1], [1], [0, 0, 0, 1, 1, 1], [0], [0]>} : vector<8x8x8xf32>, vector<8x8x8xf32>, vector<8x8x8xf32> -> vector<8x8x8xf32>
    "tpu.trace_stop"() : () -> ()
    %45 = arith.addf %44, %14 : vector<8x8x8xf32>
    %cst_19 = arith.constant dense<0xFF800000> : vector<8x8xf32>
    %46 = vector.multi_reduction <maximumf>, %45, %cst_19 [2] : vector<8x8x8xf32> to vector<8x8xf32>
    %47 = vector.shape_cast %46 : vector<8x8xf32> to vector<8x8x1xf32>
    %48 = vector.broadcast %47 : vector<8x8x1xf32> to vector<8x8x8xf32>
    %49 = arith.subf %45, %48 : vector<8x8x8xf32>
    %50 = math.exp %49 : vector<8x8x8xf32>
    %cst_20 = arith.constant dense<0.000000e+00> : vector<8x8xf32>
    %51 = vector.multi_reduction <add>, %50, %cst_20 [2] : vector<8x8x8xf32> to vector<8x8xf32>
    %52 = vector.shape_cast %51 : vector<8x8xf32> to vector<8x8x1xf32>
    %53 = tpu.reciprocal %52 : vector<8x8x1xf32> -> vector<8x8x1xf32>
    %54 = vector.broadcast %53 : vector<8x8x1xf32> to vector<8x8x8xf32>
    %55 = arith.mulf %50, %54 : vector<8x8x8xf32>
    "tpu.trace_start"() <{level = 10 : i32, message = "bnm,bmd->bnd"}> : () -> ()
    %cst_21 = arith.constant dense<0.000000e+00> : vector<8x8x8xf32>
    %56 = tpu.matmul %55, %43, %cst_21 {dimension_numbers = #tpu.dot_dimension_numbers<[2], [1], [1], [2], [0, 0, 0, 1, 1, 2], [0], [0]>} : vector<8x8x8xf32>, vector<8x8x8xf32>, vector<8x8x8xf32> -> vector<8x8x8xf32>
    "tpu.trace_stop"() : () -> ()
    %57 = vector.shape_cast %56 : vector<8x8x8xf32> to vector<64x8xf32>
    %58 = vector.extract_strided_slice %15 {offsets = [8, 0], sizes = [8, 8], strides = [1, 1]} : vector<32x8xf32> to vector<8x8xf32>
    %cst_22 = arith.constant dense<0.000000e+00> : vector<64x8xf32>
    %59 = tpu.matmul %57, %58, %cst_22 {dimension_numbers = #tpu.dot_dimension_numbers<[1], [0], [0], [1], [0, 0, 1, 1], [], []>} : vector<64x8xf32>, vector<8x8xf32>, vector<64x8xf32> -> vector<64x8xf32>
    %60 = arith.addf %37, %59 : vector<64x8xf32>
    %61 = vector.extract_strided_slice %6 {offsets = [0, 16], sizes = [64, 8], strides = [1, 1]} : vector<64x96xf32> to vector<64x8xf32>
    %62 = vector.shape_cast %61 : vector<64x8xf32> to vector<8x8x8xf32>
    %63 = vector.extract_strided_slice %6 {offsets = [0, 48], sizes = [64, 8], strides = [1, 1]} : vector<64x96xf32> to vector<64x8xf32>
    %64 = vector.shape_cast %63 : vector<64x8xf32> to vector<8x8x8xf32>
    %65 = vector.extract_strided_slice %6 {offsets = [0, 80], sizes = [64, 8], strides = [1, 1]} : vector<64x96xf32> to vector<64x8xf32>
    %66 = vector.shape_cast %65 : vector<64x8xf32> to vector<8x8x8xf32>
    "tpu.trace_start"() <{level = 10 : i32, message = "bnd,bmd->bnm"}> : () -> ()
    %cst_23 = arith.constant dense<0.000000e+00> : vector<8x8x8xf32>
    %67 = tpu.matmul %62, %64, %cst_23 {dimension_numbers = #tpu.dot_dimension_numbers<[2], [2], [1], [1], [0, 0, 0, 1, 1, 1], [0], [0]>} : vector<8x8x8xf32>, vector<8x8x8xf32>, vector<8x8x8xf32> -> vector<8x8x8xf32>
    "tpu.trace_stop"() : () -> ()
    %68 = arith.addf %67, %14 : vector<8x8x8xf32>
    %cst_24 = arith.constant dense<0xFF800000> : vector<8x8xf32>
    %69 = vector.multi_reduction <maximumf>, %68, %cst_24 [2] : vector<8x8x8xf32> to vector<8x8xf32>
    %70 = vector.shape_cast %69 : vector<8x8xf32> to vector<8x8x1xf32>
    %71 = vector.broadcast %70 : vector<8x8x1xf32> to vector<8x8x8xf32>
    %72 = arith.subf %68, %71 : vector<8x8x8xf32>
    %73 = math.exp %72 : vector<8x8x8xf32>
    %cst_25 = arith.constant dense<0.000000e+00> : vector<8x8xf32>
    %74 = vector.multi_reduction <add>, %73, %cst_25 [2] : vector<8x8x8xf32> to vector<8x8xf32>
    %75 = vector.shape_cast %74 : vector<8x8xf32> to vector<8x8x1xf32>
    %76 = tpu.reciprocal %75 : vector<8x8x1xf32> -> vector<8x8x1xf32>
    %77 = vector.broadcast %76 : vector<8x8x1xf32> to vector<8x8x8xf32>
    %78 = arith.mulf %73, %77 : vector<8x8x8xf32>
    "tpu.trace_start"() <{level = 10 : i32, message = "bnm,bmd->bnd"}> : () -> ()
    %cst_26 = arith.constant dense<0.000000e+00> : vector<8x8x8xf32>
    %79 = tpu.matmul %78, %66, %cst_26 {dimension_numbers = #tpu.dot_dimension_numbers<[2], [1], [1], [2], [0, 0, 0, 1, 1, 2], [0], [0]>} : vector<8x8x8xf32>, vector<8x8x8xf32>, vector<8x8x8xf32> -> vector<8x8x8xf32>
    "tpu.trace_stop"() : () -> ()
    %80 = vector.shape_cast %79 : vector<8x8x8xf32> to vector<64x8xf32>
    %81 = vector.extract_strided_slice %15 {offsets = [16, 0], sizes = [8, 8], strides = [1, 1]} : vector<32x8xf32> to vector<8x8xf32>
    %cst_27 = arith.constant dense<0.000000e+00> : vector<64x8xf32>
    %82 = tpu.matmul %80, %81, %cst_27 {dimension_numbers = #tpu.dot_dimension_numbers<[1], [0], [0], [1], [0, 0, 1, 1], [], []>} : vector<64x8xf32>, vector<8x8xf32>, vector<64x8xf32> -> vector<64x8xf32>
    %83 = arith.addf %60, %82 : vector<64x8xf32>
    %84 = vector.extract_strided_slice %6 {offsets = [0, 24], sizes = [64, 8], strides = [1, 1]} : vector<64x96xf32> to vector<64x8xf32>
    %85 = vector.shape_cast %84 : vector<64x8xf32> to vector<8x8x8xf32>
    %86 = vector.extract_strided_slice %6 {offsets = [0, 56], sizes = [64, 8], strides = [1, 1]} : vector<64x96xf32> to vector<64x8xf32>
    %87 = vector.shape_cast %86 : vector<64x8xf32> to vector<8x8x8xf32>
    %88 = vector.extract_strided_slice %6 {offsets = [0, 88], sizes = [64, 8], strides = [1, 1]} : vector<64x96xf32> to vector<64x8xf32>
    %89 = vector.shape_cast %88 : vector<64x8xf32> to vector<8x8x8xf32>
    "tpu.trace_start"() <{level = 10 : i32, message = "bnd,bmd->bnm"}> : () -> ()
    %cst_28 = arith.constant dense<0.000000e+00> : vector<8x8x8xf32>
    %90 = tpu.matmul %85, %87, %cst_28 {dimension_numbers = #tpu.dot_dimension_numbers<[2], [2], [1], [1], [0, 0, 0, 1, 1, 1], [0], [0]>} : vector<8x8x8xf32>, vector<8x8x8xf32>, vector<8x8x8xf32> -> vector<8x8x8xf32>
    "tpu.trace_stop"() : () -> ()
    %91 = arith.addf %90, %14 : vector<8x8x8xf32>
    %cst_29 = arith.constant dense<0xFF800000> : vector<8x8xf32>
    %92 = vector.multi_reduction <maximumf>, %91, %cst_29 [2] : vector<8x8x8xf32> to vector<8x8xf32>
    %93 = vector.shape_cast %92 : vector<8x8xf32> to vector<8x8x1xf32>
    %94 = vector.broadcast %93 : vector<8x8x1xf32> to vector<8x8x8xf32>
    %95 = arith.subf %91, %94 : vector<8x8x8xf32>
    %96 = math.exp %95 : vector<8x8x8xf32>
    %cst_30 = arith.constant dense<0.000000e+00> : vector<8x8xf32>
    %97 = vector.multi_reduction <add>, %96, %cst_30 [2] : vector<8x8x8xf32> to vector<8x8xf32>
    %98 = vector.shape_cast %97 : vector<8x8xf32> to vector<8x8x1xf32>
    %99 = tpu.reciprocal %98 : vector<8x8x1xf32> -> vector<8x8x1xf32>
    %100 = vector.broadcast %99 : vector<8x8x1xf32> to vector<8x8x8xf32>
    %101 = arith.mulf %96, %100 : vector<8x8x8xf32>
    "tpu.trace_start"() <{level = 10 : i32, message = "bnm,bmd->bnd"}> : () -> ()
    %cst_31 = arith.constant dense<0.000000e+00> : vector<8x8x8xf32>
    %102 = tpu.matmul %101, %89, %cst_31 {dimension_numbers = #tpu.dot_dimension_numbers<[2], [1], [1], [2], [0, 0, 0, 1, 1, 2], [0], [0]>} : vector<8x8x8xf32>, vector<8x8x8xf32>, vector<8x8x8xf32> -> vector<8x8x8xf32>
    "tpu.trace_stop"() : () -> ()
    %103 = vector.shape_cast %102 : vector<8x8x8xf32> to vector<64x8xf32>
    %104 = vector.extract_strided_slice %15 {offsets = [24, 0], sizes = [8, 8], strides = [1, 1]} : vector<32x8xf32> to vector<8x8xf32>
    %cst_32 = arith.constant dense<0.000000e+00> : vector<64x8xf32>
    %105 = tpu.matmul %103, %104, %cst_32 {dimension_numbers = #tpu.dot_dimension_numbers<[1], [0], [0], [1], [0, 0, 1, 1], [], []>} : vector<64x8xf32>, vector<8x8xf32>, vector<64x8xf32> -> vector<64x8xf32>
    %106 = arith.addf %83, %105 : vector<64x8xf32>
    %c0_33 = arith.constant 0 : index
    %c0_34 = arith.constant 0 : index
    %107 = vector.load %arg6[%c0_33, %c0_34] : memref<1x8xf32, #tpu.memory_space<vmem>>, vector<1x8xf32>
    %108 = vector.broadcast %107 : vector<1x8xf32> to vector<64x8xf32>
    %109 = arith.addf %106, %108 : vector<64x8xf32>
    %110 = vector.shape_cast %109 : vector<64x8xf32> to vector<8x8x8xf32>
    %c0_35 = arith.constant 0 : index
    %c0_36 = arith.constant 0 : index
    %c0_37 = arith.constant 0 : index
    %111 = vector.load %arg7[%c0_35, %c0_36, %c0_37] : memref<8x8x8xf32, #tpu.memory_space<vmem>>, vector<8x8x8xf32>
    tpu.vector_store %arg7[%c0_35, %c0_36, %c0_37], %110 {strides = array<i32>} : memref<8x8x8xf32, #tpu.memory_space<vmem>>, vector<8x8x8xf32>,
    return
  }
  func.func @transform_0(%arg0: i32) -> (i32, i32, i32) {
    %c0_i32 = arith.constant 0 : i32
    %c0_i32_0 = arith.constant 0 : i32
    %c0_i32_1 = arith.constant 0 : i32
    return %arg0, %c0_i32, %c0_i32_0 : i32, i32, i32
  }
  func.func @transform_1(%arg0: i32) -> (i32, i32) {
    %c0_i32 = arith.constant 0 : i32
    %c0_i32_0 = arith.constant 0 : i32
    %c0_i32_1 = arith.constant 0 : i32
    return %c0_i32, %c0_i32_0 : i32, i32
  }
  func.func @transform_2(%arg0: i32) -> (i32, i32) {
    %c0_i32 = arith.constant 0 : i32
    %c0_i32_0 = arith.constant 0 : i32
    %c0_i32_1 = arith.constant 0 : i32
    return %c0_i32, %c0_i32_0 : i32, i32
  }
  func.func @transform_3(%arg0: i32) -> (i32, i32) {
    %c0_i32 = arith.constant 0 : i32
    %c0_i32_0 = arith.constant 0 : i32
    %c0_i32_1 = arith.constant 0 : i32
    return %c0_i32, %c0_i32_0 : i32, i32
  }
  func.func @transform_4(%arg0: i32) -> (i32, i32) {
    %c0_i32 = arith.constant 0 : i32
    %c0_i32_0 = arith.constant 0 : i32
    %c0_i32_1 = arith.constant 0 : i32
    return %c0_i32, %c0_i32_0 : i32, i32
  }
  func.func @transform_5(%arg0: i32) -> (i32, i32) {
    %c0_i32 = arith.constant 0 : i32
    %c0_i32_0 = arith.constant 0 : i32
    %c0_i32_1 = arith.constant 0 : i32
    return %c0_i32, %c0_i32_0 : i32, i32
  }
  func.func @transform_6(%arg0: i32) -> (i32, i32, i32) {
    %c0_i32 = arith.constant 0 : i32
    %c0_i32_0 = arith.constant 0 : i32
    %c0_i32_1 = arith.constant 0 : i32
    return %arg0, %c0_i32, %c0_i32_0 : i32, i32, i32
  }
}

</mosaic_0001>

<bundles_post_ra>
// kernel: missing_gat_forward.1
= control target key start
LH: loop header
LB: loop body
LE: loop exit
PB: predicated region body
PF: predicated region fallthrough
CT: control target
= control target key end

     0   :  { %vm41_vm0 = vcmask 130048   ;;  %s7869_s0 = inlined_call_operand.vmem [shape: f32[8,8,16], index: 0, kind: input, shape index: {}]   ;;  %s7870_s1 = inlined_call_operand.vmem [shape: f32[8,8], index: 1, kind: input, shape index: {}]   ;;  %s7871_s2 = inlined_call_operand.vmem [shape: f32[16,96], index: 2, kind: input, shape index: {}]   ;;  %s7872_s3 = inlined_call_operand.vmem [shape: f32[1,96], index: 3, kind: input, shape index: {}]   ;;  %s7873_s4 = inlined_call_operand.vmem [shape: f32[32,8], index: 4, kind: input, shape index: {}]   ;;  %s7874_s5 = inlined_call_operand.vmem [shape: f32[1,8], index: 5, kind: input, shape index: {}]   ;;  %s7875_s6 = inlined_call_operand.hbm [shape: f32[8,8,8], index: 6, kind: output, shape index: {}]  }
   0x1   :  { %v32_v0 = vld [vmem:[%s7871_s2] sm:$0xff]  ;;  %v33_v1 = vld [vmem:[%s7871_s2 + $0x8] sm:$0xff] }
   0x2   :  { %v24_v2 = vld [vmem:[%s7869_s0] sm:$0xff]  ;;  %v6726_v3 = vpack.c.bf16 %v33_v1, %v32_v0 }
   0x3   :  { %6338 = vmatprep.mubr.msk.f32.mxu0 %vm41_vm0, %v24_v2  ;;  %v28_v4 = vld [vmem:[%s7869_s0 + $0x20] sm:$0xff] }
   0x4   :  { %6727 = vmatprep.subr.bf16.mxu0 %v6726_v3  ;;  %6730 = vmatprep.subr.bf16.mxu1 %v6726_v3 }
   0x5   :  { %11 = vsyncpa [#allocation3], 0  ;;  %6729 = vmatpush3.bf16.msra.mxu0 %v6726_v3  ;;  %v25_v5 = vld [vmem:[%s7869_s0 + $0x8] sm:$0xff]  ;;  %6731 = vmatpush3.bf16.msra.mxu1 %v6726_v3  ;;  %v26_v7 = vld [vmem:[%s7869_s0 + $0x10] sm:$0xff]  ;;  %v6924_v11 = vmov 0.0   ;;  %vm6925_vm1 = vmmov 0  }
   0x6   :  { %v29_v6 = vld [vmem:[%s7869_s0 + $0x28] sm:$0xff]  ;;  %6344 = vmatprep.mubr.msk.f32.mxu1 %vm41_vm0, %v28_v4  ;;  %v30_v8 = vld [vmem:[%s7869_s0 + $0x30] sm:$0xff]  ;;  %v27_v9 = vld [vmem:[%s7869_s0 + $0x18] sm:$0xff]  ;;  %6350 = vmatprep.subr.mxu1 %v6924_v11  ;;  %vm181_vm2 = vcmask 64512   ;;  %s6928_s19 = smov 120   ;;  %s6929_s20 = smov 88  }
   0x7   :  { %v31_v10 = vld [vmem:[%s7869_s0 + $0x38] sm:$0xff]  ;;  %6370 = vmatprep.subr.mxu0 %v6924_v11  ;;  %v6022_v12 = vld [vmem:[%s7872_s3] ss:$0 sm:$0xff]  ;;  %s6926_s0 = smov 96   ;;  %s6930_s21 = smov 56  }
   0x8   :  { %6339 = vmatmul.mubr.msk.f32.vlgmr.msra.gmra.mrb[0].mxu0 %vm41_vm0, %v25_v5  ;;  %6345 = vmatmul.mubr.msk.f32.vlgmr.msra.gmra.mrb[0].mxu1 %vm41_vm0, %v29_v6  ;;  %v171_v37 = vld [vmem:[%s7870_s1] sm:$0xff]  ;;  %s6927_s1 = smov 64   ;;  %s6931_s22 = smov 80  }
   0x9   :  { %6341 = vmatprep.mubr.msk.f32.mxu0 %vm41_vm0, %v26_v7  ;;  %6347 = vmatprep.mubr.msk.f32.mxu1 %vm41_vm0, %v30_v8  ;;  %vm172_vm3 = vcmp.eq.f32.partialorder %v171_v37, 0.0  ;;  %s6932_s23 = smov 112   ;;  %s6933_s24 = smov 48  }
   0xa   :  { %v7100_v40 = vsel %vm172_vm3, -inf, %v6924_v11  ;;  %s6934_s29 = smov 104   ;;  %s6935_s30 = smov 72  }
   0xb   :  { %s6936_s8 = smov 40  }
   0xc   :  { %6342 = vmatmul.mubr.msk.f32.gmra.mrb[2].mxu0 %vm41_vm0, %v27_v9  ;;  %6348 = vmatmul.mubr.msk.f32.gmra.mrb[2].mxu1 %vm41_vm0, %v31_v10 }
   0xd   :  { %6352 = vmatprep.mubr.msk.f32.mxu1 %vm6925_vm1, %v6924_v11  ;;  %6372 = vmatprep.mubr.msk.f32.mxu0 %vm6925_vm1, %v6924_v11 }
  0xdb   :  { %v6340_v13 = vpop.f32.mrb[0].mxu0  ;;  %v6346_v14 = vpop.f32.mrb[0].mxu1 }
  0xdc   :  { %v132_v15 = vpop.f32.mrb[1].mxu0  ;;  %v152_v16 = vpop.f32.mrb[1].mxu1  ;;  %v7025_v22 = vadd.f32 %v6340_v13, %v6022_v12  ;;  %v7033_v25 = vadd.f32 %v6346_v14, %v6022_v12 }
  0xdd   :  { %v7022_v17 = vadd.f32 %v6022_v12, %v132_v15  ;;  %v7035_v26 = vadd.f32 %v6022_v12, %v152_v16 }
  0xdf   :  { %v6343_v18 = vpop.f32.mrb[2].mxu0  ;;  %179 = vrot.lane.b32.xlu0 %v7022_v17, %s6926_s0  ;;  %v6349_v19 = vpop.f32.mrb[2].mxu1 }
  0xe0   :  { %v142_v20 = vpop.f32.mrb[3].mxu0  ;;  %v162_v21 = vpop.f32.mrb[3].mxu1  ;;  %v7029_v24 = vadd.f32 %v6343_v18, %v6022_v12  ;;  %v7039_v27 = vadd.f32 %v6349_v19, %v6022_v12 }
  0xe1   :  { %v7027_v23 = vadd.f32 %v6022_v12, %v142_v20  ;;  %v7043_v28 = vadd.f32 %v6022_v12, %v162_v21 }
  0xe3   :  { %334 = vrot.lane.b32.xlu1 %v7027_v23, %s6926_s0  ;;  %257 = vrot.lane.b32.xlu0 %v7025_v22, %s6926_s0 }
  0xe7   :  { %411 = vrot.lane.b32.xlu1 %v7029_v24, %s6926_s0  ;;  %565 = vrot.lane.b32.xlu0 %v7033_v25, %s6926_s0 }
  0xeb   :  { %719 = vrot.lane.b32.xlu1 %v7039_v27, %s6926_s0  ;;  %488 = vrot.lane.b32.xlu0 %v7035_v26, %s6926_s0 }
  0xef   :  { %642 = vrot.lane.b32.xlu1 %v7043_v28, %s6926_s0 }
 0x151   :  { %v180_v29 = vpop.permute.xlu0 %179 }
 0x152   :  { %6351 = vmatpush3.xpose.msk.msra.mxu1 %vm181_vm2, %v180_v29 }
 0x153   :  { %6355 = vmatprep.subr.mxu1 %v6924_v11 }
 0x155   :  { %v335_v30 = vpop.permute.xlu1 %334  ;;  %6353 = vmatmul.mubr.msk.f32.vlgmr.msra.gmra.mrb[4].mxu1 %vm181_vm2, %v7022_v17  ;;  %v258_v31 = vpop.permute.xlu0 %257 }
 0x156   :  { %6356 = vmatpush3.xpose.msk.msra.mxu1 %vm181_vm2, %v258_v31  ;;  %6357 = vmatprep.mubr.msk.f32.mxu1 %vm6925_vm1, %v6924_v11 }
 0x157   :  { %6360 = vmatprep.subr.mxu1 %v6924_v11 }
 0x159   :  { %v412_v32 = vpop.permute.xlu1 %411  ;;  %6358 = vmatmul.mubr.msk.f32.vlgmr.msra.gmra.mrb[6].mxu1 %vm181_vm2, %v7025_v22  ;;  %v566_v33 = vpop.permute.xlu0 %565 }
 0x15a   :  { %6361 = vmatpush3.xpose.msk.msra.mxu1 %vm181_vm2, %v335_v30  ;;  %6362 = vmatprep.mubr.msk.f32.mxu1 %vm6925_vm1, %v6924_v11 }
 0x15b   :  { %6365 = vmatprep.subr.mxu1 %v6924_v11 }
 0x15d   :  { %v720_v34 = vpop.permute.xlu1 %719  ;;  %6363 = vmatmul.mubr.msk.f32.vlgmr.msra.gmra.mrb[8].mxu1 %vm181_vm2, %v7027_v23  ;;  %v489_v35 = vpop.permute.xlu0 %488 }
 0x15e   :  { %6366 = vmatpush3.xpose.msk.msra.mxu1 %vm181_vm2, %v412_v32  ;;  %6371 = vmatpush3.xpose.msk.msra.mxu0 %vm181_vm2, %v489_v35 }
 0x15f   :  { %6367 = vmatprep.mubr.msk.f32.mxu1 %vm6925_vm1, %v6924_v11  ;;  %6375 = vmatprep.subr.mxu1 %v6924_v11 }
 0x160   :  { %6380 = vmatprep.subr.mxu0 %v6924_v11 }
 0x161   :  { %v643_v36 = vpop.permute.xlu1 %642  ;;  %6368 = vmatmul.mubr.msk.f32.vlgmr.msra.gmra.mrb[10].mxu1 %vm181_vm2, %v7029_v24  ;;  %6373 = vmatmul.mubr.msk.f32.vlgmr.msra.gmra.mrb[4].mxu0 %vm181_vm2, %v7035_v26 }
 0x162   :  { %6376 = vmatpush3.xpose.msk.msra.mxu1 %vm181_vm2, %v566_v33  ;;  %6381 = vmatpush3.xpose.msk.msra.mxu0 %vm181_vm2, %v643_v36 }
 0x163   :  { %6377 = vmatprep.mubr.msk.f32.mxu1 %vm6925_vm1, %v6924_v11  ;;  %6382 = vmatprep.mubr.msk.f32.mxu0 %vm6925_vm1, %v6924_v11 }
 0x164   :  { %6385 = vmatprep.subr.mxu1 %v6924_v11  ;;  %6390 = vmatprep.subr.mxu0 %v6924_v11 }
 0x165   :  { %6378 = vmatmul.mubr.msk.f32.vlgmr.msra.gmra.mrb[12].mxu1 %vm181_vm2, %v7033_v25  ;;  %6383 = vmatmul.mubr.msk.f32.vlgmr.msra.gmra.mrb[6].mxu0 %vm181_vm2, %v7043_v28 }
 0x166   :  { %6386 = vmatpush3.xpose.msk.msra.mxu1 %vm181_vm2, %v720_v34  ;;  %6387 = vmatprep.mubr.msk.f32.mxu1 %vm6925_vm1, %v6924_v11 }
 0x167   :  { %6395 = vmatprep.subr.mxu1 %v6924_v11  ;;  %6392 = vmatprep.mubr.msk.f32.mxu0 %vm6925_vm1, %v6924_v11 }
 0x169   :  { %6388 = vmatmul.mubr.msk.f32.vlgmr.msra.gmra.mrb[14].mxu1 %vm181_vm2, %v7039_v27 }
 0x16a   :  { %6397 = vmatprep.mubr.msk.f32.mxu1 %vm6925_vm1, %v6924_v11 }
 0x228   :  { %v7097_v38 = vpop.f32.mrb[4].mxu1 }
 0x229   :  { %v6354_v39 = vpop.f32.mrb[5].mxu1  ;;  %v7151_v30 = vadd.f32 %v7097_v38, %v7100_v40 }
 0x22b   :  { %v795_v33 = vsel %vm181_vm2, %v7151_v30, -inf }
 0x22c   :  { %v329_v41 = vpop.f32.mrb[6].mxu1 }
 0x22d   :  { %v330_v42 = vadd.f32 %v329_v41, %v7100_v40  ;;  %v6359_v43 = vpop.f32.mrb[7].mxu1 }
 0x22f   :  { %v798_v44 = vsel %vm181_vm2, %v330_v42, -inf }
 0x230   :  { %799 = vmax.xlane.f32.xlu0 %v798_v44  ;;  %v7104_v45 = vpop.f32.mrb[8].mxu1 }
 0x231   :  { %v6364_v46 = vpop.f32.mrb[9].mxu1  ;;  %v7147_v29 = vadd.f32 %v7104_v45, %v7100_v40 }
 0x233   :  { %v801_v31 = vsel %vm181_vm2, %v7147_v29, -inf }
 0x234   :  { %v483_v47 = vpop.f32.mrb[10].mxu1  ;;  %v7106_v48 = vpop.f32.mrb[4].mxu0 }
 0x235   :  { %v484_v49 = vadd.f32 %v483_v47, %v7100_v40  ;;  %v6369_v50 = vpop.f32.mrb[11].mxu1  ;;  %v6374_v51 = vpop.f32.mrb[5].mxu0  ;;  %v7157_v32 = vadd.f32 %v7106_v48, %v7100_v40 }
 0x237   :  { %v804_v52 = vsel %vm181_vm2, %v484_v49, -inf  ;;  %v807_v35 = vsel %vm181_vm2, %v7157_v32, -inf }
 0x238   :  { %805 = vmax.xlane.f32.xlu1 %v804_v52  ;;  %v637_v53 = vpop.f32.mrb[12].mxu1  ;;  %v7110_v54 = vpop.f32.mrb[6].mxu0 }
 0x239   :  { %v638_v55 = vadd.f32 %v637_v53, %v7100_v40  ;;  %v6379_v56 = vpop.f32.mrb[13].mxu1  ;;  %v6384_v57 = vpop.f32.mrb[7].mxu0  ;;  %v7163_v34 = vadd.f32 %v7110_v54, %v7100_v40 }
 0x23b   :  { %v810_v58 = vsel %vm181_vm2, %v638_v55, -inf  ;;  %v813_v36 = vsel %vm181_vm2, %v7163_v34, -inf }
 0x23c   :  { %811 = vmax.xlane.f32.xlu0 %v810_v58  ;;  %v791_v59 = vpop.f32.mrb[14].mxu1 }
 0x23d   :  { %v792_v60 = vadd.f32 %v791_v59, %v7100_v40  ;;  %v6389_v61 = vpop.f32.mrb[15].mxu1 }
 0x23f   :  { %v816_v62 = vsel %vm181_vm2, %v792_v60, -inf }
 0x240   :  { %817 = vmax.xlane.f32.xlu0 %v816_v62 }
 0x249   :  { %959 = vrot.lane.b32.xlu1 %v7025_v22, %s6927_s1 }
 0x2bd   :  { %v800_v63 = vpop.xlane.xlu0 %799 }
 0x2be   :  { %v820_v0 = vsub.f32 %v330_v42, %v800_v63 }
 0x2c0   :  { %v829_v1 = vmul.f32 1.442695, %v820_v0 }
 0x2c2   :  { %6772 = vpow2.f32 %v829_v1 }
 0x2c5   :  { %v806_v2 = vpop.xlane.xlu1 %805 }
 0x2c6   :  { %v822_v3 = vsub.f32 %v484_v49, %v806_v2 }
 0x2c8   :  { %v833_v4 = vmul.f32 1.442695, %v822_v3 }
 0x2c9   :  { %v960_v5 = vpop.permute.xlu1 %959  ;;  %v812_v10 = vpop.xlane.xlu0 %811 }
 0x2ca   :  { %6774 = vpow2.f32 %v833_v4  ;;  %6396 = vmatpush3.msra.mxu1 %v960_v5  ;;  %v824_v12 = vsub.f32 %v638_v55, %v812_v10 }
 0x2cb   :  { %6405 = vmatprep.subr.mxu1 %v6924_v11 }
 0x2cc   :  { %v6773_v6 = vpop.eup %6772  ;;  %v837_v13 = vmul.f32 1.442695, %v824_v12 }
 0x2cd   :  { %v846_v7 = vsel %vm181_vm2, %v6773_v6, 0.0  ;;  %v818_v14 = vpop.xlane.xlu0 %817 }
 0x2ce   :  { %847 = vadd.xlane.f32.xlu1 %v846_v7  ;;  %6776 = vpow2.f32 %v837_v13  ;;  %v826_v15 = vsub.f32 %v792_v60, %v818_v14 }
 0x2d0   :  { %v841_v16 = vmul.f32 1.442695, %v826_v15 }
 0x2d2   :  { %6778 = vpow2.f32 %v841_v16 }
 0x2d4   :  { %v6775_v8 = vpop.eup %6774 }
 0x2d5   :  { %v852_v9 = vsel %vm181_vm2, %v6775_v8, 0.0 }
 0x2d6   :  { %853 = vadd.xlane.f32.xlu0 %v852_v9 }
 0x2d8   :  { %v6777_v18 = vpop.eup %6776 }
 0x2d9   :  { %v858_v19 = vsel %vm181_vm2, %v6777_v18, 0.0 }
 0x2dc   :  { %v6779_v20 = vpop.eup %6778 }
 0x2dd   :  { %v864_v21 = vsel %vm181_vm2, %v6779_v20, 0.0 }
 0x2df   :  { %1263 = vrot.lane.b32.xlu1 %v7033_v25, %s6927_s1 }
 0x2ec   :  { %1111 = vrot.lane.b32.xlu0 %v7029_v24, %s6927_s1 }
 0x303   :  { %859 = vadd.xlane.f32.xlu1 %v858_v19 }
 0x30b   :  { %865 = vadd.xlane.f32.xlu0 %v864_v21 }
 0x314   :  { %1415 = vrot.lane.b32.xlu1 %v7039_v27, %s6927_s1 }
 0x318   :  { %1569 = vrot.lane.b32.xlu1 %v7025_v22, %s6928_s19 }
 0x31c   :  { %1725 = vrot.lane.b32.xlu1 %v7029_v24, %s6928_s19 }
 0x320   :  { %1881 = vrot.lane.b32.xlu1 %v7033_v25, %s6928_s19 }
 0x321   :  { %1571 = vrot.lane.b32.xlu0 %v7025_v22, %s6929_s20 }
 0x324   :  { %2037 = vrot.lane.b32.xlu1 %v7039_v27, %s6928_s19 }
 0x325   :  { %1727 = vrot.lane.b32.xlu0 %v7029_v24, %s6929_s20 }
 0x329   :  { %1883 = vrot.lane.b32.xlu0 %v7033_v25, %s6929_s20 }
 0x32d   :  { %2039 = vrot.lane.b32.xlu0 %v7039_v27, %s6929_s20 }
 0x348   :  { %802 = vmax.xlane.f32.xlu1 %v801_v31 }
 0x34c   :  { %796 = vmax.xlane.f32.xlu0 %v795_v33 }
 0x350   :  { %808 = vmax.xlane.f32.xlu0 %v807_v35 }
 0x354   :  { %814 = vmax.xlane.f32.xlu0 %v813_v36 }
 0x35b   :  { %v848_v37 = vpop.xlane.xlu1 %847 }
 0x35c   :  { %6780 = vrcp.f32 %v848_v37 }
 0x35f   :  { %v1264_v45 = vpop.permute.xlu1 %1263 }
 0x363   :  { %v854_v38 = vpop.xlane.xlu0 %853 }
 0x364   :  { %6782 = vrcp.f32 %v854_v38 }
 0x366   :  { %v6781_v39 = vpop.eup %6780 }
 0x367   :  { %v1112_v41 = vpop.permute.xlu0 %1111  ;;  %v876_v42 = vmul.f32 %v6781_v39, %v6773_v6 }
 0x369   :  { %6398 = vmatmul.mubr.msk.f32.vlgmr.msra.gmra.mrb[16].mxu1 %vm181_vm2, %v876_v42 }
 0x36a   :  { %6406 = vmatpush3.msra.mxu1 %v1112_v41  ;;  %6407 = vmatprep.mubr.msk.f32.mxu1 %vm6925_vm1, %v6924_v11 }
 0x36b   :  { %6415 = vmatprep.subr.mxu1 %v6924_v11 }
 0x36e   :  { %v6783_v43 = vpop.eup %6782 }
 0x36f   :  { %v878_v44 = vmul.f32 %v6783_v43, %v6775_v8 }
 0x371   :  { %6408 = vmatmul.mubr.msk.f32.vlgmr.msra.gmra.mrb[18].mxu1 %vm181_vm2, %v878_v44 }
 0x372   :  { %6416 = vmatpush3.msra.mxu1 %v1264_v45  ;;  %6417 = vmatprep.mubr.msk.f32.mxu1 %vm6925_vm1, %v6924_v11 }
 0x373   :  { %6425 = vmatprep.subr.mxu1 %v6924_v11 }
 0x390   :  { %v860_v46 = vpop.xlane.xlu1 %859 }
 0x391   :  { %6784 = vrcp.f32 %v860_v46 }
 0x394   :  { %v1416_v50 = vpop.permute.xlu1 %1415 }
 0x398   :  { %v866_v47 = vpop.xlane.xlu0 %865  ;;  %v1570_v53 = vpop.permute.xlu1 %1569 }
 0x399   :  { %6786 = vrcp.f32 %v866_v47 }
 0x39b   :  { %v6785_v48 = vpop.eup %6784 }
 0x39c   :  { %v880_v49 = vmul.f32 %v6785_v48, %v6777_v18  ;;  %v1572_v51 = vpop.permute.xlu0 %1571  ;;  %v1726_v56 = vpop.permute.xlu1 %1725 }
 0x39e   :  { %6418 = vmatmul.mubr.msk.f32.vlgmr.msra.gmra.mrb[20].mxu1 %vm181_vm2, %v880_v49 }
 0x39f   :  { %6426 = vmatpush3.msra.mxu1 %v1416_v50  ;;  %6427 = vmatprep.mubr.msk.f32.mxu1 %vm6925_vm1, %v6924_v11 }
 0x3a0   :  { %6435 = vmatprep.subr.mxu1 %v6924_v11  ;;  %v1728_v55 = vpop.permute.xlu0 %1727  ;;  %v1882_v58 = vpop.permute.xlu1 %1881 }
 0x3a3   :  { %v6787_v52 = vpop.eup %6786 }
 0x3a4   :  { %v882_v54 = vmul.f32 %v6787_v52, %v6779_v20  ;;  %v1884_v57 = vpop.permute.xlu0 %1883  ;;  %v2038_v60 = vpop.permute.xlu1 %2037 }
 0x3a6   :  { %6428 = vmatmul.mubr.msk.f32.vlgmr.msra.gmra.mrb[22].mxu1 %vm181_vm2, %v882_v54 }
 0x3a7   :  { %6436 = vmatpush3.xpose.msk.msra.mxu1 %vm181_vm2, %v1572_v51  ;;  %6437 = vmatprep.mubr.msk.f32.mxu1 %vm6925_vm1, %v6924_v11 }
 0x3a8   :  { %6445 = vmatprep.subr.mxu1 %v6924_v11  ;;  %v2040_v59 = vpop.permute.xlu0 %2039 }
 0x3aa   :  { %6438 = vmatmul.mubr.msk.f32.vlgmr.msra.gmra.mrb[24].mxu1 %vm181_vm2, %v1570_v53 }
 0x3ab   :  { %6446 = vmatpush3.xpose.msk.msra.mxu1 %vm181_vm2, %v1728_v55  ;;  %6447 = vmatprep.mubr.msk.f32.mxu1 %vm6925_vm1, %v6924_v11 }
 0x3ac   :  { %6455 = vmatprep.subr.mxu1 %v6924_v11 }
 0x3ae   :  { %6448 = vmatmul.mubr.msk.f32.vlgmr.msra.gmra.mrb[26].mxu1 %vm181_vm2, %v1726_v56 }
 0x3af   :  { %6456 = vmatpush3.xpose.msk.msra.mxu1 %vm181_vm2, %v1884_v57  ;;  %6457 = vmatprep.mubr.msk.f32.mxu1 %vm6925_vm1, %v6924_v11 }
 0x3b0   :  { %6465 = vmatprep.subr.mxu1 %v6924_v11 }
 0x3b2   :  { %6458 = vmatmul.mubr.msk.f32.vlgmr.msra.gmra.mrb[28].mxu1 %vm181_vm2, %v1882_v58 }
 0x3b3   :  { %6466 = vmatpush3.xpose.msk.msra.mxu1 %vm181_vm2, %v2040_v59  ;;  %6467 = vmatprep.mubr.msk.f32.mxu1 %vm6925_vm1, %v6924_v11 }
 0x3b4   :  { %6475 = vmatprep.subr.mxu1 %v6924_v11 }
 0x3b6   :  { %6468 = vmatmul.mubr.msk.f32.vlgmr.msra.gmra.mrb[30].mxu1 %vm181_vm2, %v2038_v60 }
 0x3b7   :  { %6477 = vmatprep.mubr.msk.f32.mxu1 %vm6925_vm1, %v6924_v11 }
 0x3d5   :  { %v803_v61 = vpop.xlane.xlu1 %802 }
 0x3d6   :  { %v821_v62 = vsub.f32 %v7147_v29, %v803_v61 }
 0x3d8   :  { %v831_v63 = vmul.f32 1.442695, %v821_v62 }
 0x3d9   :  { %v797_v0 = vpop.xlane.xlu0 %796 }
 0x3da   :  { %6788 = vpow2.f32 %v831_v63  ;;  %v819_v1 = vsub.f32 %v7151_v30, %v797_v0 }
 0x3dc   :  { %v827_v2 = vmul.f32 1.442695, %v819_v1 }
 0x3dd   :  { %v809_v3 = vpop.xlane.xlu0 %808 }
 0x3de   :  { %6790 = vpow2.f32 %v827_v2  ;;  %v823_v4 = vsub.f32 %v7157_v32, %v809_v3 }
 0x3e0   :  { %v835_v5 = vmul.f32 1.442695, %v823_v4 }
 0x3e1   :  { %v815_v6 = vpop.xlane.xlu0 %814 }
 0x3e2   :  { %6792 = vpow2.f32 %v835_v5  ;;  %v825_v7 = vsub.f32 %v7163_v34, %v815_v6 }
 0x3e4   :  { %v7208_v8 = vpop.eup %6788  ;;  %v839_v9 = vmul.f32 1.442695, %v825_v7 }
 0x3e5   :  { %v849_v10 = vsel %vm181_vm2, %v7208_v8, 0.0 }
 0x3e6   :  { %6794 = vpow2.f32 %v839_v9  ;;  %850 = vadd.xlane.f32.xlu0 %v849_v10 }
 0x3e8   :  { %v6791_v12 = vpop.eup %6790 }
 0x3e9   :  { %v843_v13 = vsel %vm181_vm2, %v6791_v12, 0.0 }
 0x3ea   :  { %844 = vadd.xlane.f32.xlu1 %v843_v13 }
 0x3ec   :  { %v7213_v14 = vpop.eup %6792 }
 0x3ed   :  { %v855_v15 = vsel %vm181_vm2, %v7213_v14, 0.0 }
 0x3ee   :  { %856 = vadd.xlane.f32.xlu1 %v855_v15 }
 0x3f0   :  { %v7217_v16 = vpop.eup %6794 }
 0x3f1   :  { %v861_v18 = vsel %vm181_vm2, %v7217_v16, 0.0 }
 0x3f2   :  { %862 = vadd.xlane.f32.xlu0 %v861_v18 }
 0x3ff   :  { %883 = vrot.lane.b32.xlu1 %v7022_v17, %s6927_s1 }
 0x403   :  { %1187 = vrot.lane.b32.xlu1 %v7035_v26, %s6927_s1 }
 0x407   :  { %1339 = vrot.lane.b32.xlu1 %v7043_v28, %s6927_s1 }
 0x408   :  { %1035 = vrot.lane.b32.xlu0 %v7027_v23, %s6927_s1 }
 0x40b   :  { %1491 = vrot.lane.b32.xlu1 %v7022_v17, %s6928_s19 }
 0x40c   :  { %1493 = vrot.lane.b32.xlu0 %v7022_v17, %s6929_s20 }
 0x40f   :  { %1647 = vrot.lane.b32.xlu1 %v7027_v23, %s6928_s19 }
 0x410   :  { %1649 = vrot.lane.b32.xlu0 %v7027_v23, %s6929_s20 }
 0x413   :  { %1803 = vrot.lane.b32.xlu1 %v7035_v26, %s6928_s19 }
 0x414   :  { %1805 = vrot.lane.b32.xlu0 %v7035_v26, %s6929_s20 }
 0x417   :  { %1959 = vrot.lane.b32.xlu1 %v7043_v28, %s6928_s19 }
 0x418   :  { %1961 = vrot.lane.b32.xlu0 %v7043_v28, %s6929_s20 }
 0x43c   :  { %v7245_v19 = vpop.f32.mrb[16].mxu1 }
 0x43d   :  { %v6399_v20 = vpop.f32.mrb[17].mxu1 }
 0x444   :  { %v7247_v21 = vpop.f32.mrb[18].mxu1 }
 0x445   :  { %v6409_v29 = vpop.f32.mrb[19].mxu1 }
 0x471   :  { %v7249_v30 = vpop.f32.mrb[20].mxu1 }
 0x472   :  { %v6419_v31 = vpop.f32.mrb[21].mxu1 }
 0x473   :  { %v851_v32 = vpop.xlane.xlu0 %850 }
 0x477   :  { %v845_v33 = vpop.xlane.xlu1 %844 }
 0x478   :  { %6796 = vrcp.f32 %v845_v33 }
 0x479   :  { %v7251_v34 = vpop.f32.mrb[22].mxu1  ;;  %6798 = vrcp.f32 %v851_v32 }
 0x47a   :  { %v6429_v35 = vpop.f32.mrb[23].mxu1 }
 0x47b   :  { %v857_v36 = vpop.xlane.xlu1 %856 }
 0x47c   :  { %6800 = vrcp.f32 %v857_v36 }
 0x47d   :  { %v1643_v37 = vpop.f32.mrb[24].mxu1 }
 0x47e   :  { %v7254_v38 = vadd.f32 %v1643_v37, %v7100_v40  ;;  %v6439_v39 = vpop.f32.mrb[25].mxu1 }
 0x47f   :  { %v884_v41 = vpop.permute.xlu1 %883  ;;  %v863_v42 = vpop.xlane.xlu0 %862 }
 0x480   :  { %6391 = vmatpush3.msra.mxu0 %v884_v41  ;;  %v2118_v43 = vsel %vm181_vm2, %v7254_v38, -inf  ;;  %6802 = vrcp.f32 %v863_v42 }
 0x481   :  { %v1799_v44 = vpop.f32.mrb[26].mxu1  ;;  %2119 = vmax.xlane.f32.xlu0 %v2118_v43  ;;  %6400 = vmatprep.subr.mxu0 %v6924_v11 }
 0x482   :  { %v6797_v45 = vpop.eup %6796  ;;  %v7260_v46 = vadd.f32 %v1799_v44, %v7100_v40  ;;  %v6449_v47 = vpop.f32.mrb[27].mxu1 }
 0x483   :  { %v1036_v48 = vpop.permute.xlu0 %1035  ;;  %v875_v49 = vmul.f32 %v6797_v45, %v6791_v12  ;;  %v6799_v50 = vpop.eup %6798 }
 0x484   :  { %v2124_v51 = vsel %vm181_vm2, %v7260_v46, -inf  ;;  %v1188_v52 = vpop.permute.xlu1 %1187  ;;  %v877_v56 = vmul.f32 %v6799_v50, %v7208_v8 }
 0x485   :  { %v1955_v53 = vpop.f32.mrb[28].mxu1  ;;  %2125 = vmax.xlane.f32.xlu1 %v2124_v51  ;;  %6393 = vmatmul.mubr.msk.f32.vlgmr.msra.gmra.mrb[8].mxu0 %vm181_vm2, %v875_v49 }
 0x486   :  { %v7266_v54 = vadd.f32 %v1955_v53, %v7100_v40  ;;  %6401 = vmatpush3.msra.mxu0 %v1036_v48  ;;  %v6459_v55 = vpop.f32.mrb[29].mxu1  ;;  %6402 = vmatprep.mubr.msk.f32.mxu0 %vm6925_vm1, %v6924_v11  ;;  %v6801_v57 = vpop.eup %6800 }
 0x487   :  { %6410 = vmatprep.subr.mxu0 %v6924_v11  ;;  %v879_v63 = vmul.f32 %v6801_v57, %v7213_v14  ;;  %v1494_v2 = vpop.permute.xlu0 %1493 }
 0x488   :  { %v2130_v58 = vsel %vm181_vm2, %v7266_v54, -inf  ;;  %v1340_v62 = vpop.permute.xlu1 %1339 }
 0x489   :  { %v2111_v59 = vpop.f32.mrb[30].mxu1  ;;  %2131 = vmax.xlane.f32.xlu0 %v2130_v58  ;;  %6403 = vmatmul.mubr.msk.f32.vlgmr.msra.gmra.mrb[10].mxu0 %vm181_vm2, %v877_v56 }
 0x48a   :  { %v7276_v60 = vadd.f32 %v2111_v59, %v7100_v40  ;;  %6411 = vmatpush3.msra.mxu0 %v1188_v52  ;;  %v6469_v61 = vpop.f32.mrb[31].mxu1  ;;  %6412 = vmatprep.mubr.msk.f32.mxu0 %vm6925_vm1, %v6924_v11  ;;  %v6803_v0 = vpop.eup %6802 }
 0x48b   :  { %6420 = vmatprep.subr.mxu0 %v6924_v11  ;;  %v881_v3 = vmul.f32 %v6803_v0, %v7217_v16  ;;  %v1650_v5 = vpop.permute.xlu0 %1649 }
 0x48c   :  { %v2136_v1 = vsel %vm181_vm2, %v7276_v60, -inf  ;;  %v1492_v4 = vpop.permute.xlu1 %1491 }
 0x48d   :  { %2137 = vmax.xlane.f32.xlu0 %v2136_v1  ;;  %6413 = vmatmul.mubr.msk.f32.vlgmr.msra.gmra.mrb[12].mxu0 %vm181_vm2, %v879_v63 }
 0x48e   :  { %6421 = vmatpush3.msra.mxu0 %v1340_v62  ;;  %6422 = vmatprep.mubr.msk.f32.mxu0 %vm6925_vm1, %v6924_v11 }
 0x48f   :  { %6430 = vmatprep.subr.mxu0 %v6924_v11  ;;  %v1806_v7 = vpop.permute.xlu0 %1805 }
 0x490   :  { %v1648_v6 = vpop.permute.xlu1 %1647 }
 0x491   :  { %6423 = vmatmul.mubr.msk.f32.vlgmr.msra.gmra.mrb[14].mxu0 %vm181_vm2, %v881_v3 }
 0x492   :  { %6432 = vmatprep.mubr.msk.f32.mxu0 %vm6925_vm1, %v6924_v11 }
 0x493   :  { %v1962_v9 = vpop.permute.xlu0 %1961 }
 0x494   :  { %v1804_v8 = vpop.permute.xlu1 %1803 }
 0x495   :  { %6431 = vmatpush3.xpose.msk.msra.mxu0 %vm181_vm2, %v1494_v2 }
 0x496   :  { %2279 = vrot.lane.b32.xlu1 %v7025_v22, %s6930_s21  ;;  %6440 = vmatprep.subr.mxu0 %v6924_v11 }
 0x498   :  { %6433 = vmatmul.mubr.msk.f32.vlgmr.msra.gmra.mrb[16].mxu0 %vm181_vm2, %v1492_v4  ;;  %v1960_v10 = vpop.permute.xlu1 %1959 }
 0x499   :  { %6441 = vmatpush3.xpose.msk.msra.mxu0 %vm181_vm2, %v1650_v5  ;;  %6442 = vmatprep.mubr.msk.f32.mxu0 %vm6925_vm1, %v6924_v11 }
 0x49a   :  { %2583 = vrot.lane.b32.xlu1 %v7033_v25, %s6930_s21  ;;  %6450 = vmatprep.subr.mxu0 %v6924_v11 }
 0x49c   :  { %6443 = vmatmul.mubr.msk.f32.vlgmr.msra.gmra.mrb[18].mxu0 %vm181_vm2, %v1648_v6 }
 0x49d   :  { %6451 = vmatpush3.xpose.msk.msra.mxu0 %vm181_vm2, %v1806_v7  ;;  %6452 = vmatprep.mubr.msk.f32.mxu0 %vm6925_vm1, %v6924_v11 }
 0x49e   :  { %6460 = vmatprep.subr.mxu0 %v6924_v11 }
 0x4a0   :  { %6453 = vmatmul.mubr.msk.f32.vlgmr.msra.gmra.mrb[20].mxu0 %vm181_vm2, %v1804_v8 }
 0x4a1   :  { %6461 = vmatpush3.xpose.msk.msra.mxu0 %vm181_vm2, %v1962_v9  ;;  %6462 = vmatprep.mubr.msk.f32.mxu0 %vm6925_vm1, %v6924_v11 }
 0x4a2   :  { %6470 = vmatprep.subr.mxu0 %v6924_v11 }
 0x4a3   :  { %2431 = vrot.lane.b32.xlu0 %v7029_v24, %s6930_s21 }
 0x4a4   :  { %6463 = vmatmul.mubr.msk.f32.vlgmr.msra.gmra.mrb[22].mxu0 %vm181_vm2, %v1960_v10 }
 0x4a5   :  { %6472 = vmatprep.mubr.msk.f32.mxu0 %vm6925_vm1, %v6924_v11 }
 0x50e   :  { %v2120_v12 = vpop.xlane.xlu0 %2119 }
 0x50f   :  { %v2140_v13 = vsub.f32 %v7254_v38, %v2120_v12 }
 0x511   :  { %v2149_v14 = vmul.f32 1.442695, %v2140_v13 }
 0x512   :  { %v2126_v15 = vpop.xlane.xlu1 %2125 }
 0x513   :  { %6804 = vpow2.f32 %v2149_v14  ;;  %v2142_v16 = vsub.f32 %v7260_v46, %v2126_v15 }
 0x515   :  { %v2153_v18 = vmul.f32 1.442695, %v2142_v16 }
 0x516   :  { %v2280_v20 = vpop.permute.xlu1 %2279  ;;  %v2132_v29 = vpop.xlane.xlu0 %2131 }
 0x517   :  { %6806 = vpow2.f32 %v2153_v18  ;;  %v2144_v31 = vsub.f32 %v7266_v54, %v2132_v29  ;;  %6476 = vmatpush3.msra.mxu1 %v2280_v20 }
 0x518   :  { %6485 = vmatprep.subr.mxu1 %v6924_v11 }
 0x519   :  { %v2157_v32 = vmul.f32 1.442695, %v2144_v31 }
 0x51a   :  { %v2138_v41 = vpop.xlane.xlu0 %2137  ;;  %v2584_v3 = vpop.permute.xlu1 %2583 }
 0x51b   :  { %6808 = vpow2.f32 %v2157_v32  ;;  %v2146_v42 = vsub.f32 %v7276_v60, %v2138_v41 }
 0x51d   :  { %v7322_v33 = vpop.eup %6804  ;;  %v2161_v43 = vmul.f32 1.442695, %v2146_v42 }
 0x51e   :  { %v2166_v35 = vsel %vm181_vm2, %v7322_v33, 0.0  ;;  %v2432_v6 = vpop.permute.xlu0 %2431 }
 0x51f   :  { %2167 = vadd.xlane.f32.xlu1 %v2166_v35  ;;  %6810 = vpow2.f32 %v2161_v43 }
 0x521   :  { %v7326_v36 = vpop.eup %6806 }
 0x522   :  { %v2172_v37 = vsel %vm181_vm2, %v7326_v36, 0.0 }
 0x523   :  { %2173 = vadd.xlane.f32.xlu0 %v2172_v37 }
 0x525   :  { %v7330_v38 = vpop.eup %6808 }
 0x526   :  { %v2178_v39 = vsel %vm181_vm2, %v7330_v38, 0.0 }
 0x527   :  { %2179 = vadd.xlane.f32.xlu1 %v2178_v39 }
 0x529   :  { %v7345_v44 = vpop.eup %6810 }
 0x52a   :  { %v2184_v45 = vsel %vm181_vm2, %v7345_v44, 0.0 }
 0x538   :  { %2735 = vrot.lane.b32.xlu1 %v7039_v27, %s6930_s21 }
 0x539   :  { %3071 = vrot.lane.b32.xlu0 %v7022_v17, %s6931_s22 }
 0x53c   :  { %3069 = vrot.lane.b32.xlu1 %v7022_v17, %s6932_s23 }
 0x540   :  { %3147 = vrot.lane.b32.xlu1 %v7025_v22, %s6932_s23 }
 0x544   :  { %3225 = vrot.lane.b32.xlu1 %v7027_v23, %s6932_s23 }
 0x548   :  { %3303 = vrot.lane.b32.xlu1 %v7029_v24, %s6932_s23 }
 0x54c   :  { %3381 = vrot.lane.b32.xlu1 %v7035_v26, %s6932_s23 }
 0x550   :  { %3459 = vrot.lane.b32.xlu1 %v7033_v25, %s6932_s23 }
 0x554   :  { %3537 = vrot.lane.b32.xlu1 %v7043_v28, %s6932_s23 }
 0x558   :  { %v7350_v46 = vpop.f32.mrb[8].mxu0  ;;  %3615 = vrot.lane.b32.xlu1 %v7039_v27, %s6932_s23  ;;  %2185 = vadd.xlane.f32.xlu0 %v2184_v45 }
 0x559   :  { %v6394_v47 = vpop.f32.mrb[9].mxu0 }
 0x55c   :  { %v7353_v48 = vpop.f32.mrb[10].mxu0 }
 0x55d   :  { %v6404_v49 = vpop.f32.mrb[11].mxu0 }
 0x560   :  { %v7355_v50 = vpop.f32.mrb[12].mxu0 }
 0x561   :  { %v6414_v51 = vpop.f32.mrb[13].mxu0 }
 0x564   :  { %v7357_v52 = vpop.f32.mrb[14].mxu0 }
 0x565   :  { %v6424_v53 = vpop.f32.mrb[15].mxu0 }
 0x56b   :  { %v1565_v54 = vpop.f32.mrb[16].mxu0 }
 0x56c   :  { %v6434_v55 = vpop.f32.mrb[17].mxu0  ;;  %v7379_v0 = vadd.f32 %v1565_v54, %v7100_v40 }
 0x56e   :  { %3149 = vrot.lane.b32.xlu0 %v7025_v22, %s6931_s22  ;;  %v2115_v2 = vsel %vm181_vm2, %v7379_v0, -inf }
 0x56f   :  { %v1721_v56 = vpop.f32.mrb[18].mxu0 }
 0x570   :  { %v6444_v57 = vpop.f32.mrb[19].mxu0  ;;  %v7366_v60 = vadd.f32 %v1721_v56, %v7100_v40 }
 0x572   :  { %3227 = vrot.lane.b32.xlu0 %v7027_v23, %s6931_s22  ;;  %v2121_v63 = vsel %vm181_vm2, %v7366_v60, -inf }
 0x573   :  { %v1877_v58 = vpop.f32.mrb[20].mxu0 }
 0x574   :  { %v6454_v59 = vpop.f32.mrb[21].mxu0  ;;  %v7382_v1 = vadd.f32 %v1877_v58, %v7100_v40 }
 0x576   :  { %3305 = vrot.lane.b32.xlu0 %v7029_v24, %s6931_s22  ;;  %v2127_v5 = vsel %vm181_vm2, %v7382_v1, -inf }
 0x577   :  { %v2033_v61 = vpop.f32.mrb[22].mxu0 }
 0x578   :  { %v6464_v62 = vpop.f32.mrb[23].mxu0  ;;  %v7387_v4 = vadd.f32 %v2033_v61, %v7100_v40 }
 0x57a   :  { %3383 = vrot.lane.b32.xlu0 %v7035_v26, %s6931_s22  ;;  %v2133_v8 = vsel %vm181_vm2, %v7387_v4, -inf }
 0x57c   :  { %2122 = vmax.xlane.f32.xlu1 %v2121_v63 }
 0x57e   :  { %3461 = vrot.lane.b32.xlu0 %v7033_v25, %s6931_s22 }
 0x582   :  { %3539 = vrot.lane.b32.xlu0 %v7043_v28, %s6931_s22 }
 0x586   :  { %3617 = vrot.lane.b32.xlu0 %v7039_v27, %s6931_s22 }
 0x5a5   :  { %2116 = vmax.xlane.f32.xlu0 %v2115_v2 }
 0x5a9   :  { %2128 = vmax.xlane.f32.xlu0 %v2127_v5 }
 0x5ac   :  { %v2168_v7 = vpop.xlane.xlu1 %2167 }
 0x5ad   :  { %6812 = vrcp.f32 %v2168_v7  ;;  %2134 = vmax.xlane.f32.xlu0 %v2133_v8 }
 0x5b0   :  { %v2174_v9 = vpop.xlane.xlu0 %2173 }
 0x5b1   :  { %6814 = vrcp.f32 %v2174_v9 }
 0x5b4   :  { %v2180_v10 = vpop.xlane.xlu1 %2179  ;;  %v3072_v31 = vpop.permute.xlu0 %3071 }
 0x5b5   :  { %6816 = vrcp.f32 %v2180_v10 }
 0x5b7   :  { %v6813_v12 = vpop.eup %6812 }
 0x5b8   :  { %v2196_v13 = vmul.f32 %v6813_v12, %v7322_v33  ;;  %v2736_v20 = vpop.permute.xlu1 %2735 }
 0x5ba   :  { %6478 = vmatmul.mubr.msk.f32.vlgmr.msra.gmra.mrb[32].mxu1 %vm181_vm2, %v2196_v13 }
 0x5bb   :  { %v6815_v14 = vpop.eup %6814  ;;  %6486 = vmatpush3.msra.mxu1 %v2432_v6  ;;  %6487 = vmatprep.mubr.msk.f32.mxu1 %vm6925_vm1, %v6924_v11 }
 0x5bc   :  { %v2198_v15 = vmul.f32 %v6815_v14, %v7326_v36  ;;  %6495 = vmatprep.subr.mxu1 %v6924_v11  ;;  %v3070_v29 = vpop.permute.xlu1 %3069 }
 0x5be   :  { %6488 = vmatmul.mubr.msk.f32.vlgmr.msra.gmra.mrb[34].mxu1 %vm181_vm2, %v2198_v15 }
 0x5bf   :  { %v6817_v16 = vpop.eup %6816  ;;  %6496 = vmatpush3.msra.mxu1 %v2584_v3  ;;  %6497 = vmatprep.mubr.msk.f32.mxu1 %vm6925_vm1, %v6924_v11 }
 0x5c0   :  { %v2200_v18 = vmul.f32 %v6817_v16, %v7330_v38  ;;  %6505 = vmatprep.subr.mxu1 %v6924_v11  ;;  %v3148_v32 = vpop.permute.xlu1 %3147 }
 0x5c2   :  { %6498 = vmatmul.mubr.msk.f32.vlgmr.msra.gmra.mrb[36].mxu1 %vm181_vm2, %v2200_v18 }
 0x5c3   :  { %6506 = vmatpush3.msra.mxu1 %v2736_v20  ;;  %6507 = vmatprep.mubr.msk.f32.mxu1 %vm6925_vm1, %v6924_v11 }
 0x5c4   :  { %6538 = vmatprep.subr.mxu1 %v6924_v11  ;;  %v3226_v35 = vpop.permute.xlu1 %3225 }
 0x5c8   :  { %v3304_v37 = vpop.permute.xlu1 %3303 }
 0x5cc   :  { %v3382_v42 = vpop.permute.xlu1 %3381 }
 0x5e5   :  { %v2186_v33 = vpop.xlane.xlu0 %2185 }
 0x5e6   :  { %6818 = vrcp.f32 %v2186_v33 }
 0x5e9   :  { %v3150_v36 = vpop.permute.xlu0 %3149 }
 0x5ed   :  { %v3228_v41 = vpop.permute.xlu0 %3227 }
 0x5f0   :  { %v6819_v38 = vpop.eup %6818 }
 0x5f1   :  { %v2202_v39 = vmul.f32 %v6819_v38, %v7345_v44  ;;  %v3306_v43 = vpop.permute.xlu0 %3305  ;;  %v3460_v44 = vpop.permute.xlu1 %3459 }
 0x5f3   :  { %6508 = vmatmul.mubr.msk.f32.vlgmr.msra.gmra.mrb[38].mxu1 %vm181_vm2, %v2202_v39 }
 0x5f4   :  { %6539 = vmatpush3.xpose.msk.msra.mxu1 %vm181_vm2, %v3072_v31  ;;  %6540 = vmatprep.mubr.msk.f32.mxu1 %vm6925_vm1, %v6924_v11 }
 0x5f5   :  { %6543 = vmatprep.subr.mxu1 %v6924_v11  ;;  %v3384_v45 = vpop.permute.xlu0 %3383  ;;  %v3538_v47 = vpop.permute.xlu1 %3537 }
 0x5f7   :  { %6541 = vmatmul.mubr.msk.f32.vlgmr.msra.gmra.mrb[40].mxu1 %vm181_vm2, %v3070_v29 }
 0x5f8   :  { %6544 = vmatpush3.xpose.msk.msra.mxu1 %vm181_vm2, %v3150_v36  ;;  %6545 = vmatprep.mubr.msk.f32.mxu1 %vm6925_vm1, %v6924_v11 }
 0x5f9   :  { %6548 = vmatprep.subr.mxu1 %v6924_v11  ;;  %v3462_v49 = vpop.permute.xlu0 %3461  ;;  %v3616_v51 = vpop.permute.xlu1 %3615 }
 0x5fb   :  { %6546 = vmatmul.mubr.msk.f32.vlgmr.msra.gmra.mrb[42].mxu1 %vm181_vm2, %v3148_v32 }
 0x5fc   :  { %6549 = vmatpush3.xpose.msk.msra.mxu1 %vm181_vm2, %v3228_v41  ;;  %6550 = vmatprep.mubr.msk.f32.mxu1 %vm6925_vm1, %v6924_v11 }
 0x5fd   :  { %6553 = vmatprep.subr.mxu1 %v6924_v11  ;;  %v3540_v53 = vpop.permute.xlu0 %3539 }
 0x5ff   :  { %6551 = vmatmul.mubr.msk.f32.vlgmr.msra.gmra.mrb[44].mxu1 %vm181_vm2, %v3226_v35 }
 0x600   :  { %6554 = vmatpush3.xpose.msk.msra.mxu1 %vm181_vm2, %v3306_v43  ;;  %6555 = vmatprep.mubr.msk.f32.mxu1 %vm6925_vm1, %v6924_v11 }
 0x601   :  { %6558 = vmatprep.subr.mxu1 %v6924_v11  ;;  %v3618_v57 = vpop.permute.xlu0 %3617 }
 0x603   :  { %6556 = vmatmul.mubr.msk.f32.vlgmr.msra.gmra.mrb[46].mxu1 %vm181_vm2, %v3304_v37 }
 0x604   :  { %6559 = vmatpush3.xpose.msk.msra.mxu1 %vm181_vm2, %v3384_v45  ;;  %6560 = vmatprep.mubr.msk.f32.mxu1 %vm6925_vm1, %v6924_v11 }
 0x605   :  { %6563 = vmatprep.subr.mxu1 %v6924_v11 }
 0x607   :  { %6561 = vmatmul.mubr.msk.f32.vlgmr.msra.gmra.mrb[48].mxu1 %vm181_vm2, %v3382_v42 }
 0x608   :  { %6564 = vmatpush3.xpose.msk.msra.mxu1 %vm181_vm2, %v3462_v49  ;;  %6565 = vmatprep.mubr.msk.f32.mxu1 %vm6925_vm1, %v6924_v11 }
 0x609   :  { %v2123_v54 = vpop.xlane.xlu1 %2122  ;;  %6568 = vmatprep.subr.mxu1 %v6924_v11 }
 0x60a   :  { %v2141_v55 = vsub.f32 %v7366_v60, %v2123_v54 }
 0x60b   :  { %6566 = vmatmul.mubr.msk.f32.vlgmr.msra.gmra.mrb[50].mxu1 %vm181_vm2, %v3460_v44 }
 0x60c   :  { %v2151_v56 = vmul.f32 1.442695, %v2141_v55  ;;  %6569 = vmatpush3.xpose.msk.msra.mxu1 %vm181_vm2, %v3540_v53  ;;  %6570 = vmatprep.mubr.msk.f32.mxu1 %vm6925_vm1, %v6924_v11 }
 0x60d   :  { %6573 = vmatprep.subr.mxu1 %v6924_v11 }
 0x60e   :  { %6820 = vpow2.f32 %v2151_v56 }
 0x60f   :  { %6571 = vmatmul.mubr.msk.f32.vlgmr.msra.gmra.mrb[52].mxu1 %vm181_vm2, %v3538_v47 }
 0x610   :  { %6574 = vmatpush3.xpose.msk.msra.mxu1 %vm181_vm2, %v3618_v57  ;;  %6575 = vmatprep.mubr.msk.f32.mxu1 %vm6925_vm1, %v6924_v11 }
 0x611   :  { %6583 = vmatprep.subr.mxu1 %v6924_v11 }
 0x613   :  { %6576 = vmatmul.mubr.msk.f32.vlgmr.msra.gmra.mrb[54].mxu1 %vm181_vm2, %v3616_v51 }
 0x614   :  { %6585 = vmatprep.mubr.msk.f32.mxu1 %vm6925_vm1, %v6924_v11 }
 0x618   :  { %v7453_v58 = vpop.eup %6820 }
 0x619   :  { %v2169_v59 = vsel %vm181_vm2, %v7453_v58, 0.0 }
 0x61a   :  { %2170 = vadd.xlane.f32.xlu0 %v2169_v59 }
 0x632   :  { %v2117_v60 = vpop.xlane.xlu0 %2116 }
 0x633   :  { %v2139_v61 = vsub.f32 %v7379_v0, %v2117_v60 }
 0x635   :  { %v2147_v62 = vmul.f32 1.442695, %v2139_v61 }
 0x636   :  { %v2129_v63 = vpop.xlane.xlu0 %2128 }
 0x637   :  { %6822 = vpow2.f32 %v2147_v62  ;;  %v2143_v2 = vsub.f32 %v7382_v1, %v2129_v63 }
 0x639   :  { %v2155_v3 = vmul.f32 1.442695, %v2143_v2 }
 0x63a   :  { %v2135_v5 = vpop.xlane.xlu0 %2134 }
 0x63b   :  { %6824 = vpow2.f32 %v2155_v3  ;;  %v2145_v6 = vsub.f32 %v7387_v4, %v2135_v5 }
 0x63d   :  { %v2159_v7 = vmul.f32 1.442695, %v2145_v6 }
 0x63f   :  { %6826 = vpow2.f32 %v2159_v7 }
 0x641   :  { %v6823_v8 = vpop.eup %6822 }
 0x642   :  { %v2163_v9 = vsel %vm181_vm2, %v6823_v8, 0.0 }
 0x643   :  { %2164 = vadd.xlane.f32.xlu1 %v2163_v9 }
 0x645   :  { %v7461_v10 = vpop.eup %6824 }
 0x646   :  { %v2175_v0 = vsel %vm181_vm2, %v7461_v10, 0.0 }
 0x647   :  { %2176 = vadd.xlane.f32.xlu1 %v2175_v0 }
 0x649   :  { %v7465_v12 = vpop.eup %6826 }
 0x64a   :  { %v2181_v1 = vsel %vm181_vm2, %v7465_v12, 0.0 }
 0x64b   :  { %2182 = vadd.xlane.f32.xlu0 %v2181_v1 }
 0x658   :  { %2203 = vrot.lane.b32.xlu1 %v7022_v17, %s6930_s21 }
 0x65c   :  { %2507 = vrot.lane.b32.xlu1 %v7035_v26, %s6930_s21 }
 0x660   :  { %2659 = vrot.lane.b32.xlu1 %v7043_v28, %s6930_s21 }
 0x661   :  { %2355 = vrot.lane.b32.xlu0 %v7027_v23, %s6930_s21 }
 0x68d   :  { %v7477_v4 = vpop.f32.mrb[32].mxu1 }
 0x68e   :  { %v6479_v13 = vpop.f32.mrb[33].mxu1 }
 0x691   :  { %v7479_v14 = vpop.f32.mrb[34].mxu1 }
 0x692   :  { %v6489_v15 = vpop.f32.mrb[35].mxu1 }
 0x695   :  { %v7481_v16 = vpop.f32.mrb[36].mxu1 }
 0x696   :  { %v6499_v18 = vpop.f32.mrb[37].mxu1 }
 0x6a7   :  { %v2171_v39 = vpop.xlane.xlu0 %2170 }
 0x6c6   :  { %v7483_v20 = vpop.f32.mrb[38].mxu1 }
 0x6c7   :  { %v6509_v29 = vpop.f32.mrb[39].mxu1 }
 0x6ca   :  { %v3143_v31 = vpop.f32.mrb[40].mxu1 }
 0x6cb   :  { %v7486_v32 = vadd.f32 %v3143_v31, %v7100_v40  ;;  %v6542_v33 = vpop.f32.mrb[41].mxu1 }
 0x6cd   :  { %v3693_v35 = vsel %vm181_vm2, %v7486_v32, -inf }
 0x6ce   :  { %v3221_v36 = vpop.f32.mrb[42].mxu1  ;;  %3694 = vmax.xlane.f32.xlu0 %v3693_v35 }
 0x6cf   :  { %v7491_v37 = vadd.f32 %v3221_v36, %v7100_v40  ;;  %v6547_v38 = vpop.f32.mrb[43].mxu1 }
 0x6d0   :  { %v2165_v41 = vpop.xlane.xlu1 %2164 }
 0x6d1   :  { %6828 = vrcp.f32 %v2165_v41  ;;  %v3696_v42 = vsel %vm181_vm2, %v7491_v37, -inf }
 0x6d2   :  { %v3299_v43 = vpop.f32.mrb[44].mxu1  ;;  %3697 = vmax.xlane.f32.xlu1 %v3696_v42  ;;  %6830 = vrcp.f32 %v2171_v39  ;;  %v7559_v42 = vld [vmem:[%s7873_s4] sm:$0xff] }
 0x6d3   :  { %v7496_v44 = vadd.f32 %v3299_v43, %v7100_v40  ;;  %v6552_v45 = vpop.f32.mrb[45].mxu1 }
 0x6d4   :  { %v2177_v47 = vpop.xlane.xlu1 %2176 }
 0x6d5   :  { %v3699_v49 = vsel %vm181_vm2, %v7496_v44, -inf  ;;  %6832 = vrcp.f32 %v2177_v47 }
 0x6d6   :  { %v3377_v51 = vpop.f32.mrb[46].mxu1  ;;  %3700 = vmax.xlane.f32.xlu0 %v3699_v49 }
 0x6d7   :  { %v7501_v53 = vadd.f32 %v3377_v51, %v7100_v40  ;;  %v6557_v54 = vpop.f32.mrb[47].mxu1 }
 0x6d8   :  { %v2204_v55 = vpop.permute.xlu1 %2203  ;;  %v2183_v56 = vpop.xlane.xlu0 %2182 }
 0x6d9   :  { %6471 = vmatpush3.msra.mxu0 %v2204_v55  ;;  %v3702_v57 = vsel %vm181_vm2, %v7501_v53, -inf  ;;  %6834 = vrcp.f32 %v2183_v56 }
 0x6da   :  { %v3455_v59 = vpop.f32.mrb[48].mxu1  ;;  %3703 = vmax.xlane.f32.xlu0 %v3702_v57  ;;  %6480 = vmatprep.subr.mxu0 %v6924_v11 }
 0x6db   :  { %v6829_v60 = vpop.eup %6828  ;;  %v7507_v61 = vadd.f32 %v3455_v59, %v7100_v40  ;;  %v6562_v62 = vpop.f32.mrb[49].mxu1 }
 0x6dc   :  { %v2195_v63 = vmul.f32 %v6829_v60, %v6823_v8  ;;  %v2356_v2 = vpop.permute.xlu0 %2355  ;;  %v6831_v3 = vpop.eup %6830 }
 0x6dd   :  { %v3705_v5 = vsel %vm181_vm2, %v7507_v61, -inf  ;;  %v2197_v0 = vmul.f32 %v6831_v3, %v7453_v58  ;;  %v2508_v8 = vpop.permute.xlu1 %2507 }
 0x6de   :  { %v3533_v6 = vpop.f32.mrb[50].mxu1  ;;  %3706 = vmax.xlane.f32.xlu1 %v3705_v5  ;;  %6473 = vmatmul.mubr.msk.f32.vlgmr.msra.gmra.mrb[24].mxu0 %vm181_vm2, %v2195_v63 }
 0x6df   :  { %v7513_v7 = vadd.f32 %v3533_v6, %v7100_v40  ;;  %6481 = vmatpush3.msra.mxu0 %v2356_v2  ;;  %v6567_v9 = vpop.f32.mrb[51].mxu1  ;;  %6482 = vmatprep.mubr.msk.f32.mxu0 %vm6925_vm1, %v6924_v11  ;;  %v6833_v1 = vpop.eup %6832 }
 0x6e0   :  { %6490 = vmatprep.subr.mxu0 %v6924_v11  ;;  %v2199_v58 = vmul.f32 %v6833_v1, %v7461_v10 }
 0x6e1   :  { %v3708_v13 = vsel %vm181_vm2, %v7513_v7, -inf  ;;  %v2660_v35 = vpop.permute.xlu1 %2659 }
 0x6e2   :  { %v3611_v15 = vpop.f32.mrb[52].mxu1  ;;  %3709 = vmax.xlane.f32.xlu0 %v3708_v13  ;;  %6483 = vmatmul.mubr.msk.f32.vlgmr.msra.gmra.mrb[26].mxu0 %vm181_vm2, %v2197_v0 }
 0x6e3   :  { %v7523_v18 = vadd.f32 %v3611_v15, %v7100_v40  ;;  %6491 = vmatpush3.msra.mxu0 %v2508_v8  ;;  %v6572_v29 = vpop.f32.mrb[53].mxu1  ;;  %6492 = vmatprep.mubr.msk.f32.mxu0 %vm6925_vm1, %v6924_v11  ;;  %v6835_v31 = vpop.eup %6834 }
 0x6e4   :  { %6500 = vmatprep.subr.mxu0 %v6924_v11  ;;  %v2201_v10 = vmul.f32 %v6835_v31, %v7465_v12  ;;  %v175_v12 = vld [vmem:[%s7873_s4 + $0x8] sm:$0xff] }
 0x6e5   :  { %v3711_v33 = vsel %vm181_vm2, %v7523_v18, -inf }
 0x6e6   :  { %v3689_v36 = vpop.f32.mrb[54].mxu1  ;;  %3712 = vmax.xlane.f32.xlu1 %v3711_v33  ;;  %6493 = vmatmul.mubr.msk.f32.vlgmr.msra.gmra.mrb[28].mxu0 %vm181_vm2, %v2199_v58 }
 0x6e7   :  { %v7533_v38 = vadd.f32 %v3689_v36, %v7100_v40  ;;  %6501 = vmatpush3.msra.mxu0 %v2660_v35  ;;  %v6577_v39 = vpop.f32.mrb[55].mxu1  ;;  %6502 = vmatprep.mubr.msk.f32.mxu0 %vm6925_vm1, %v6924_v11 }
 0x6e8   :  { %6510 = vmatprep.subr.mxu0 %v175_v12 }
 0x6e9   :  { %v3714_v41 = vsel %vm181_vm2, %v7533_v38, -inf }
 0x6ea   :  { %3715 = vmax.xlane.f32.xlu0 %v3714_v41  ;;  %6503 = vmatmul.mubr.msk.f32.vlgmr.msra.gmra.mrb[30].mxu0 %vm181_vm2, %v2201_v10 }
 0x6eb   :  { %6511 = vmatpush3.msra.mxu0 %v175_v12 }
 0x6ec   :  { %6524 = vmatprep.subr.mxu0 %v7559_v42 }
 0x6f7   :  { %3781 = vrot.lane.b32.xlu1 %v7022_v17, %s6933_s24 }
 0x6fb   :  { %3933 = vrot.lane.b32.xlu1 %v7027_v23, %s6933_s24 }
 0x6ff   :  { %4009 = vrot.lane.b32.xlu1 %v7029_v24, %s6933_s24 }
 0x700   :  { %3857 = vrot.lane.b32.xlu0 %v7025_v22, %s6933_s24 }
 0x703   :  { %4161 = vrot.lane.b32.xlu1 %v7033_v25, %s6933_s24 }
 0x704   :  { %4085 = vrot.lane.b32.xlu0 %v7035_v26, %s6933_s24 }
 0x75b   :  { %v3695_v43 = vpop.xlane.xlu0 %3694 }
 0x75c   :  { %v3717_v45 = vsub.f32 %v7486_v32, %v3695_v43 }
 0x75e   :  { %v3725_v47 = vmul.f32 1.442695, %v3717_v45 }
 0x75f   :  { %v3698_v49 = vpop.xlane.xlu1 %3697 }
 0x760   :  { %6836 = vpow2.f32 %v3725_v47  ;;  %v3718_v51 = vsub.f32 %v7491_v37, %v3698_v49 }
 0x762   :  { %v3727_v54 = vmul.f32 1.442695, %v3718_v51 }
 0x763   :  { %v3701_v55 = vpop.xlane.xlu0 %3700 }
 0x764   :  { %6838 = vpow2.f32 %v3727_v54  ;;  %v3719_v56 = vsub.f32 %v7496_v44, %v3701_v55 }
 0x766   :  { %v3729_v57 = vmul.f32 1.442695, %v3719_v56 }
 0x767   :  { %v3704_v59 = vpop.xlane.xlu0 %3703 }
 0x768   :  { %6840 = vpow2.f32 %v3729_v57  ;;  %v3720_v60 = vsub.f32 %v7501_v53, %v3704_v59 }
 0x76a   :  { %v7566_v62 = vpop.eup %6836  ;;  %v3731_v63 = vmul.f32 1.442695, %v3720_v60 }
 0x76b   :  { %v3707_v2 = vpop.xlane.xlu1 %3706  ;;  %v3741_v32 = vsel %vm181_vm2, %v7566_v62, 0.0 }
 0x76c   :  { %6842 = vpow2.f32 %v3731_v63  ;;  %v3721_v37 = vsub.f32 %v7507_v61, %v3707_v2  ;;  %3742 = vadd.xlane.f32.xlu1 %v3741_v32 }
 0x76e   :  { %v7571_v3 = vpop.eup %6838  ;;  %v3733_v5 = vmul.f32 1.442695, %v3721_v37 }
 0x76f   :  { %v3710_v44 = vpop.xlane.xlu0 %3709  ;;  %v3744_v6 = vsel %vm181_vm2, %v7571_v3, 0.0 }
 0x770   :  { %6844 = vpow2.f32 %v3733_v5  ;;  %v3722_v53 = vsub.f32 %v7513_v7, %v3710_v44  ;;  %3745 = vadd.xlane.f32.xlu0 %v3744_v6 }
 0x772   :  { %v7576_v9 = vpop.eup %6840  ;;  %v3735_v0 = vmul.f32 1.442695, %v3722_v53  ;;  %v176_v53 = vld [vmem:[%s7873_s4 + $0x10] sm:$0xff] }
 0x773   :  { %v3713_v8 = vpop.xlane.xlu1 %3712  ;;  %v3747_v1 = vsel %vm181_vm2, %v7576_v9, 0.0 }
 0x774   :  { %6846 = vpow2.f32 %v3735_v0  ;;  %v3723_v61 = vsub.f32 %v7523_v18, %v3713_v8  ;;  %3748 = vadd.xlane.f32.xlu1 %v3747_v1 }
 0x776   :  { %v7581_v13 = vpop.eup %6842  ;;  %v3737_v15 = vmul.f32 1.442695, %v3723_v61 }
 0x777   :  { %v3716_v29 = vpop.xlane.xlu0 %3715  ;;  %v3750_v58 = vsel %vm181_vm2, %v7581_v13, 0.0 }
 0x778   :  { %6848 = vpow2.f32 %v3737_v15  ;;  %v3724_v7 = vsub.f32 %v7533_v38, %v3716_v29  ;;  %3751 = vadd.xlane.f32.xlu0 %v3750_v58 }
 0x77a   :  { %v7586_v31 = vpop.eup %6844  ;;  %v3739_v33 = vmul.f32 1.442695, %v3724_v7 }
 0x77b   :  { %v3858_v35 = vpop.permute.xlu0 %3857  ;;  %v3753_v36 = vsel %vm181_vm2, %v7586_v31, 0.0 }
 0x77c   :  { %6850 = vpow2.f32 %v3739_v33  ;;  %3754 = vadd.xlane.f32.xlu1 %v3753_v36  ;;  %6584 = vmatpush3.msra.mxu1 %v3858_v35 }
 0x77d   :  { %6593 = vmatprep.subr.mxu1 %v6924_v11 }
 0x77e   :  { %v7591_v18 = vpop.eup %6846 }
 0x77f   :  { %v3756_v39 = vsel %vm181_vm2, %v7591_v18, 0.0 }
 0x780   :  { %3757 = vadd.xlane.f32.xlu0 %v3756_v39 }
 0x782   :  { %v7595_v38 = vpop.eup %6848 }
 0x783   :  { %v3759_v10 = vsel %vm181_vm2, %v7595_v38, 0.0 }
 0x784   :  { %3760 = vadd.xlane.f32.xlu1 %v3759_v10 }
 0x786   :  { %v7599_v41 = vpop.eup %6850 }
 0x787   :  { %v3762_v12 = vsel %vm181_vm2, %v7599_v41, 0.0 }
 0x788   :  { %3763 = vadd.xlane.f32.xlu0 %v3762_v12 }
 0x795   :  { %4313 = vrot.lane.b32.xlu1 %v7039_v27, %s6933_s24 }
 0x799   :  { %4526 = vrot.lane.b32.xlu1 %v7022_v17, %s6934_s29 }
 0x79d   :  { %4604 = vrot.lane.b32.xlu1 %v7025_v22, %s6934_s29 }
 0x79e   :  { %4237 = vrot.lane.b32.xlu0 %v7043_v28, %s6933_s24 }
 0x7a1   :  { %4682 = vrot.lane.b32.xlu1 %v7027_v23, %s6934_s29 }
 0x7a2   :  { %4528 = vrot.lane.b32.xlu0 %v7022_v17, %s6935_s30 }
 0x7a5   :  { %4760 = vrot.lane.b32.xlu1 %v7029_v24, %s6934_s29 }
 0x7a6   :  { %4606 = vrot.lane.b32.xlu0 %v7025_v22, %s6935_s30 }
 0x7a9   :  { %4918 = vrot.lane.b32.xlu1 %v7033_v25, %s6935_s30 }
 0x7aa   :  { %4684 = vrot.lane.b32.xlu0 %v7027_v23, %s6935_s30 }
 0x7ad   :  { %4916 = vrot.lane.b32.xlu1 %v7033_v25, %s6934_s29 }
 0x7ae   :  { %4762 = vrot.lane.b32.xlu0 %v7029_v24, %s6935_s30 }
 0x7b1   :  { %v2275_v43 = vpop.f32.mrb[24].mxu0  ;;  %5074 = vrot.lane.b32.xlu1 %v7039_v27, %s6935_s30 }
 0x7b2   :  { %v6474_v45 = vpop.f32.mrb[25].mxu0  ;;  %6512 = vmatprep.mubr.msk.f32.mxu0 %vm181_vm2, %v2275_v43  ;;  %4840 = vrot.lane.b32.xlu0 %v7035_v26, %s6935_s30 }
 0x7b3   :  { %6513 = vmatmul.mubr.msk.f32.vlgmr.msra.gmra.mrb[32].mxu0 %vm181_vm2, %v7477_v4 }
 0x7b4   :  { %6525 = vmatpush3.msra.mxu0 %v7559_v42 }
 0x7b5   :  { %v2427_v47 = vpop.f32.mrb[26].mxu0  ;;  %5072 = vrot.lane.b32.xlu1 %v7039_v27, %s6934_s29  ;;  %6578 = vmatprep.subr.mxu0 %v6924_v11 }
 0x7b6   :  { %v6484_v49 = vpop.f32.mrb[27].mxu0  ;;  %6515 = vmatprep.mubr.msk.f32.mxu0 %vm181_vm2, %v2427_v47  ;;  %4838 = vrot.lane.b32.xlu0 %v7035_v26, %s6934_s29 }
 0x7b7   :  { %6516 = vmatmul.mubr.msk.f32.gmra.mrb[34].mxu0 %vm181_vm2, %v7479_v14  ;;  %v3782_v14 = vpop.permute.xlu1 %3781 }
 0x7b9   :  { %v2579_v51 = vpop.f32.mrb[28].mxu0 }
 0x7ba   :  { %v6494_v54 = vpop.f32.mrb[29].mxu0  ;;  %6518 = vmatprep.mubr.msk.f32.mxu0 %vm181_vm2, %v2579_v51  ;;  %4996 = vrot.lane.b32.xlu0 %v7043_v28, %s6935_s30 }
 0x7bb   :  { %6519 = vmatmul.mubr.msk.f32.gmra.mrb[36].mxu0 %vm181_vm2, %v7481_v16  ;;  %v4086_v16 = vpop.permute.xlu0 %4085 }
 0x7bd   :  { %v2731_v4 = vpop.f32.mrb[30].mxu0 }
 0x7be   :  { %v6504_v42 = vpop.f32.mrb[31].mxu0  ;;  %6521 = vmatprep.mubr.msk.f32.mxu0 %vm181_vm2, %v2731_v4  ;;  %4994 = vrot.lane.b32.xlu0 %v7043_v28, %s6934_s29 }
 0x7bf   :  { %6522 = vmatmul.mubr.msk.f32.gmra.mrb[38].mxu0 %vm181_vm2, %v7483_v20 }
 0x7c0   :  { %6526 = vmatprep.mubr.msk.f32.mxu0 %vm181_vm2, %v7350_v46 }
 0x7c3   :  { %6527 = vmatmul.mubr.msk.f32.vlgmr.msra.gmra.mrb[32].mxu0 %vm181_vm2, %v7245_v19  ;;  %v3934_v19 = vpop.permute.xlu1 %3933 }
 0x7c4   :  { %6579 = vmatpush3.msra.mxu0 %v3782_v14  ;;  %6529 = vmatprep.mubr.msk.f32.mxu0 %vm181_vm2, %v7353_v48 }
 0x7c5   :  { %6588 = vmatprep.subr.mxu0 %v6924_v11 }
 0x7c7   :  { %6530 = vmatmul.mubr.msk.f32.gmra.mrb[34].mxu0 %vm181_vm2, %v7247_v21  ;;  %v4010_v46 = vpop.permute.xlu1 %4009 }
 0x7c8   :  { %6532 = vmatprep.mubr.msk.f32.mxu0 %vm181_vm2, %v7355_v50 }
 0x7cb   :  { %6533 = vmatmul.mubr.msk.f32.gmra.mrb[36].mxu0 %vm181_vm2, %v7249_v30  ;;  %v4162_v48 = vpop.permute.xlu1 %4161 }
 0x7cc   :  { %6535 = vmatprep.mubr.msk.f32.mxu0 %vm181_vm2, %v7357_v52 }
 0x7cf   :  { %6536 = vmatmul.mubr.msk.f32.gmra.mrb[38].mxu0 %vm181_vm2, %v7251_v34 }
 0x7d0   :  { %6580 = vmatprep.mubr.msk.f32.mxu0 %vm6925_vm1, %v6924_v11 }
 0x7f9   :  { %v3743_v21 = vpop.xlane.xlu1 %3742 }
 0x7fa   :  { %6852 = vrcp.f32 %v3743_v21 }
 0x7fd   :  { %v3746_v20 = vpop.xlane.xlu0 %3745 }
 0x7fe   :  { %6854 = vrcp.f32 %v3746_v20 }
 0x801   :  { %v3749_v50 = vpop.xlane.xlu1 %3748 }
 0x802   :  { %6856 = vrcp.f32 %v3749_v50 }
 0x804   :  { %v6853_v30 = vpop.eup %6852 }
 0x805   :  { %v3773_v55 = vmul.f32 %v6853_v30, %v7566_v62  ;;  %v3752_v52 = vpop.xlane.xlu0 %3751 }
 0x806   :  { %6858 = vrcp.f32 %v3752_v52 }
 0x807   :  { %6581 = vmatmul.mubr.msk.f32.vlgmr.msra.gmra.mrb[40].mxu0 %vm181_vm2, %v3773_v55 }
 0x808   :  { %v6855_v34 = vpop.eup %6854  ;;  %6589 = vmatpush3.msra.mxu0 %v3934_v19  ;;  %6590 = vmatprep.mubr.msk.f32.mxu0 %vm6925_vm1, %v6924_v11 }
 0x809   :  { %v3774_v56 = vmul.f32 %v6855_v34, %v7571_v3  ;;  %v3755_v57 = vpop.xlane.xlu1 %3754  ;;  %6598 = vmatprep.subr.mxu0 %v6924_v11 }
 0x80a   :  { %6860 = vrcp.f32 %v3755_v57 }
 0x80b   :  { %6586 = vmatmul.mubr.msk.f32.vlgmr.msra.gmra.mrb[56].mxu1 %vm181_vm2, %v3774_v56 }
 0x80c   :  { %v6857_v59 = vpop.eup %6856  ;;  %6594 = vmatpush3.msra.mxu1 %v4010_v46  ;;  %6595 = vmatprep.mubr.msk.f32.mxu1 %vm6925_vm1, %v6924_v11 }
 0x80d   :  { %v3775_v60 = vmul.f32 %v6857_v59, %v7576_v9  ;;  %v3758_v62 = vpop.xlane.xlu0 %3757  ;;  %6603 = vmatprep.subr.mxu1 %v6924_v11 }
 0x80e   :  { %6862 = vrcp.f32 %v3758_v62 }
 0x80f   :  { %6591 = vmatmul.mubr.msk.f32.vlgmr.msra.gmra.mrb[42].mxu0 %vm181_vm2, %v3775_v60 }
 0x810   :  { %v6859_v63 = vpop.eup %6858  ;;  %6599 = vmatpush3.msra.mxu0 %v4086_v16  ;;  %6600 = vmatprep.mubr.msk.f32.mxu0 %vm6925_vm1, %v6924_v11 }
 0x811   :  { %v3776_v2 = vmul.f32 %v6859_v63, %v7581_v13  ;;  %v3761_v32 = vpop.xlane.xlu1 %3760  ;;  %6608 = vmatprep.subr.mxu0 %v6924_v11 }
 0x812   :  { %6864 = vrcp.f32 %v3761_v32 }
 0x813   :  { %6596 = vmatmul.mubr.msk.f32.vlgmr.msra.gmra.mrb[58].mxu1 %vm181_vm2, %v3776_v2 }
 0x814   :  { %v6861_v37 = vpop.eup %6860  ;;  %6604 = vmatpush3.msra.mxu1 %v4162_v48  ;;  %6605 = vmatprep.mubr.msk.f32.mxu1 %vm6925_vm1, %v6924_v11 }
 0x815   :  { %v3777_v3 = vmul.f32 %v6861_v37, %v7586_v31  ;;  %v4314_v5 = vpop.permute.xlu1 %4313  ;;  %v3764_v44 = vpop.xlane.xlu0 %3763  ;;  %6613 = vmatprep.subr.mxu1 %v6924_v11 }
 0x816   :  { %6866 = vrcp.f32 %v3764_v44 }
 0x817   :  { %6601 = vmatmul.mubr.msk.f32.vlgmr.msra.gmra.mrb[44].mxu0 %vm181_vm2, %v3777_v3 }
 0x818   :  { %v6863_v6 = vpop.eup %6862  ;;  %6610 = vmatprep.mubr.msk.f32.mxu0 %vm6925_vm1, %v6924_v11 }
 0x819   :  { %v3778_v9 = vmul.f32 %v6863_v6, %v7591_v18  ;;  %v4527_v0 = vpop.permute.xlu1 %4526  ;;  %v4238_v8 = vpop.permute.xlu0 %4237 }
 0x81a   :  { %6609 = vmatpush3.msra.mxu0 %v4238_v8 }
 0x81b   :  { %6606 = vmatmul.mubr.msk.f32.vlgmr.msra.gmra.mrb[60].mxu1 %vm181_vm2, %v3778_v9  ;;  %6618 = vmatprep.subr.mxu0 %v176_v53 }
 0x81c   :  { %v6865_v1 = vpop.eup %6864  ;;  %6614 = vmatpush3.msra.mxu1 %v4314_v5  ;;  %6615 = vmatprep.mubr.msk.f32.mxu1 %vm6925_vm1, %v6924_v11 }
 0x81d   :  { %v3779_v61 = vmul.f32 %v6865_v1, %v7595_v38  ;;  %v4605_v13 = vpop.permute.xlu1 %4604  ;;  %v4529_v15 = vpop.permute.xlu0 %4528  ;;  %6632 = vmatprep.subr.mxu1 %v6924_v11 }
 0x81f   :  { %6611 = vmatmul.mubr.msk.f32.vlgmr.msra.gmra.mrb[46].mxu0 %vm181_vm2, %v3779_v61 }
 0x820   :  { %v6867_v29 = vpop.eup %6866  ;;  %6619 = vmatpush3.msra.mxu0 %v176_v53 }
 0x821   :  { %v3780_v58 = vmul.f32 %v6867_v29, %v7599_v41  ;;  %v4683_v7 = vpop.permute.xlu1 %4682  ;;  %6652 = vmatprep.subr.mxu0 %v6924_v11  ;;  %v4607_v31 = vpop.permute.xlu0 %4606 }
 0x823   :  { %6616 = vmatmul.mubr.msk.f32.vlgmr.msra.gmra.mrb[62].mxu1 %vm181_vm2, %v3780_v58 }
 0x824   :  { %6633 = vmatpush3.xpose.msk.msra.mxu1 %vm181_vm2, %v4529_v15  ;;  %6634 = vmatprep.mubr.msk.f32.mxu1 %vm6925_vm1, %v6924_v11 }
 0x825   :  { %v4761_v33 = vpop.permute.xlu1 %4760  ;;  %6637 = vmatprep.subr.mxu1 %v6924_v11  ;;  %v4685_v35 = vpop.permute.xlu0 %4684 }
 0x827   :  { %6635 = vmatmul.mubr.msk.f32.vlgmr.msra.gmra.mrb[64].mxu1 %vm181_vm2, %v4527_v0 }
 0x828   :  { %6638 = vmatpush3.xpose.msk.msra.mxu1 %vm181_vm2, %v4607_v31  ;;  %6639 = vmatprep.mubr.msk.f32.mxu1 %vm6925_vm1, %v6924_v11 }
 0x829   :  { %v4919_v36 = vpop.permute.xlu1 %4918  ;;  %6642 = vmatprep.subr.mxu1 %v6924_v11  ;;  %v4763_v39 = vpop.permute.xlu0 %4762 }
 0x82b   :  { %6640 = vmatmul.mubr.msk.f32.vlgmr.msra.gmra.mrb[66].mxu1 %vm181_vm2, %v4605_v13 }
 0x82c   :  { %6643 = vmatpush3.xpose.msk.msra.mxu1 %vm181_vm2, %v4685_v35  ;;  %6644 = vmatprep.mubr.msk.f32.mxu1 %vm6925_vm1, %v6924_v11 }
 0x82d   :  { %6647 = vmatprep.subr.mxu1 %v6924_v11  ;;  %v4917_v18 = vpop.permute.xlu1 %4916  ;;  %v4841_v45 = vpop.permute.xlu0 %4840 }
 0x82f   :  { %6645 = vmatmul.mubr.msk.f32.vlgmr.msra.gmra.mrb[68].mxu1 %vm181_vm2, %v4683_v7 }
 0x830   :  { %6648 = vmatpush3.xpose.msk.msra.mxu1 %vm181_vm2, %v4763_v39  ;;  %6649 = vmatprep.mubr.msk.f32.mxu1 %vm6925_vm1, %v6924_v11 }
 0x831   :  { %6657 = vmatprep.subr.mxu1 %v6924_v11  ;;  %v5075_v38 = vpop.permute.xlu1 %5074  ;;  %v4839_v48 = vpop.permute.xlu0 %4838 }
 0x833   :  { %6650 = vmatmul.mubr.msk.f32.vlgmr.msra.gmra.mrb[70].mxu1 %vm181_vm2, %v4761_v33 }
 0x834   :  { %6658 = vmatpush3.xpose.msk.msra.mxu1 %vm181_vm2, %v4919_v36  ;;  %6659 = vmatprep.mubr.msk.f32.mxu1 %vm6925_vm1, %v6924_v11 }
 0x835   :  { %6667 = vmatprep.subr.mxu1 %v6924_v11  ;;  %v5073_v10 = vpop.permute.xlu1 %5072  ;;  %v4997_v30 = vpop.permute.xlu0 %4996 }
 0x837   :  { %6660 = vmatmul.mubr.msk.f32.vlgmr.msra.gmra.mrb[72].mxu1 %vm181_vm2, %v4917_v18 }
 0x838   :  { %6668 = vmatpush3.xpose.msk.msra.mxu1 %vm181_vm2, %v5075_v38  ;;  %6669 = vmatprep.mubr.msk.f32.mxu1 %vm6925_vm1, %v6924_v11 }
 0x839   :  { %6677 = vmatprep.subr.mxu1 %v6924_v11  ;;  %v4995_v57 = vpop.permute.xlu0 %4994 }
 0x83b   :  { %6670 = vmatmul.mubr.msk.f32.vlgmr.msra.gmra.mrb[74].mxu1 %vm181_vm2, %v5073_v10 }
 0x83c   :  { %6679 = vmatprep.mubr.msk.f32.mxu1 %vm6925_vm1, %v6924_v11 }
 0x8da   :  { %v3853_v41 = vpop.f32.mrb[40].mxu0 }
 0x8db   :  { %v6582_v12 = vpop.f32.mrb[41].mxu0  ;;  %6620 = vmatprep.mubr.msk.f32.mxu0 %vm181_vm2, %v3853_v41 }
 0x8de   :  { %v3929_v43 = vpop.f32.mrb[56].mxu1 }
 0x8df   :  { %v6587_v47 = vpop.f32.mrb[57].mxu1  ;;  %6621 = vmatmul.mubr.msk.f32.vlgmr.msra.gmra.mrb[32].mxu0 %vm181_vm2, %v3929_v43 }
 0x8e0   :  { %6653 = vmatpush3.xpose.msk.msra.mxu0 %vm181_vm2, %v4841_v45 }
 0x8e1   :  { %6662 = vmatprep.subr.mxu0 %v6924_v11 }
 0x8e2   :  { %v4005_v49 = vpop.f32.mrb[42].mxu0 }
 0x8e3   :  { %v6592_v51 = vpop.f32.mrb[43].mxu0  ;;  %6623 = vmatprep.mubr.msk.f32.mxu0 %vm181_vm2, %v4005_v49 }
 0x8e6   :  { %v4081_v54 = vpop.f32.mrb[58].mxu1 }
 0x8e7   :  { %v6597_v4 = vpop.f32.mrb[59].mxu1  ;;  %6624 = vmatmul.mubr.msk.f32.gmra.mrb[34].mxu0 %vm181_vm2, %v4081_v54 }
 0x8ea   :  { %v4157_v42 = vpop.f32.mrb[44].mxu0 }
 0x8eb   :  { %v6602_v14 = vpop.f32.mrb[45].mxu0  ;;  %6626 = vmatprep.mubr.msk.f32.mxu0 %vm181_vm2, %v4157_v42 }
 0x8ee   :  { %v4233_v19 = vpop.f32.mrb[60].mxu1 }
 0x8ef   :  { %v6607_v46 = vpop.f32.mrb[61].mxu1  ;;  %6627 = vmatmul.mubr.msk.f32.gmra.mrb[36].mxu0 %vm181_vm2, %v4233_v19 }
 0x8f2   :  { %v4309_v16 = vpop.f32.mrb[46].mxu0 }
 0x8f3   :  { %v6612_v21 = vpop.f32.mrb[47].mxu0  ;;  %6629 = vmatprep.mubr.msk.f32.mxu0 %vm181_vm2, %v4309_v16 }
 0x8f6   :  { %v4385_v20 = vpop.f32.mrb[62].mxu1 }
 0x8f7   :  { %v6617_v50 = vpop.f32.mrb[63].mxu1  ;;  %6630 = vmatmul.mubr.msk.f32.gmra.mrb[38].mxu0 %vm181_vm2, %v4385_v20 }
 0x8f8   :  { %6654 = vmatprep.mubr.msk.f32.mxu0 %vm6925_vm1, %v6924_v11 }
 0x8fa   :  { %v4600_v55 = vpop.f32.mrb[64].mxu1 }
 0x8fb   :  { %v7746_v52 = vadd.f32 %v4600_v55, %v7100_v40  ;;  %v6636_v34 = vpop.f32.mrb[65].mxu1  ;;  %6655 = vmatmul.mubr.msk.f32.vlgmr.msra.gmra.mrb[48].mxu0 %vm181_vm2, %v4839_v48 }
 0x8fc   :  { %6663 = vmatpush3.xpose.msk.msra.mxu0 %vm181_vm2, %v4997_v30  ;;  %6664 = vmatprep.mubr.msk.f32.mxu0 %vm6925_vm1, %v6924_v11 }
 0x8fd   :  { %v5150_v56 = vsel %vm181_vm2, %v7746_v52, -inf  ;;  %6672 = vmatprep.subr.mxu0 %v6924_v11 }
 0x8fe   :  { %5151 = vmax.xlane.f32.xlu0 %v5150_v56  ;;  %v4678_v59 = vpop.f32.mrb[66].mxu1 }
 0x8ff   :  { %v4679_v60 = vadd.f32 %v4678_v59, %v7100_v40  ;;  %v6641_v62 = vpop.f32.mrb[67].mxu1  ;;  %6665 = vmatmul.mubr.msk.f32.vlgmr.msra.gmra.mrb[50].mxu0 %vm181_vm2, %v4995_v57 }
 0x900   :  { %6674 = vmatprep.mubr.msk.f32.mxu0 %vm6925_vm1, %v6924_v11 }
 0x901   :  { %v5153_v63 = vsel %vm181_vm2, %v4679_v60, -inf }
 0x902   :  { %5154 = vmax.xlane.f32.xlu1 %v5153_v63  ;;  %v4756_v2 = vpop.f32.mrb[68].mxu1 }
 0x903   :  { %v4757_v32 = vadd.f32 %v4756_v2, %v7100_v40  ;;  %v6646_v37 = vpop.f32.mrb[69].mxu1 }
 0x905   :  { %v5156_v3 = vsel %vm181_vm2, %v4757_v32, -inf }
 0x906   :  { %5157 = vmax.xlane.f32.xlu0 %v5156_v3  ;;  %v4834_v5 = vpop.f32.mrb[70].mxu1 }
 0x907   :  { %v4835_v44 = vadd.f32 %v4834_v5, %v7100_v40  ;;  %v6651_v6 = vpop.f32.mrb[71].mxu1 }
 0x909   :  { %v5159_v53 = vsel %vm181_vm2, %v4835_v44, -inf }
 0x90a   :  { %5160 = vmax.xlane.f32.xlu0 %v5159_v53  ;;  %v4990_v9 = vpop.f32.mrb[72].mxu1 }
 0x90b   :  { %v4991_v0 = vadd.f32 %v4990_v9, %v7100_v40  ;;  %v6661_v8 = vpop.f32.mrb[73].mxu1 }
 0x90d   :  { %v5165_v1 = vsel %vm181_vm2, %v4991_v0, -inf }
 0x90e   :  { %5166 = vmax.xlane.f32.xlu0 %v5165_v1  ;;  %v5146_v61 = vpop.f32.mrb[74].mxu1 }
 0x90f   :  { %v5147_v13 = vadd.f32 %v5146_v61, %v7100_v40  ;;  %v6671_v15 = vpop.f32.mrb[75].mxu1 }
 0x911   :  { %v5171_v29 = vsel %vm181_vm2, %v5147_v13, -inf }
 0x912   :  { %5172 = vmax.xlane.f32.xlu0 %v5171_v29 }
 0x98b   :  { %v5152_v58 = vpop.xlane.xlu0 %5151 }
 0x98c   :  { %v5174_v46 = vsub.f32 %v7746_v52, %v5152_v58 }
 0x98e   :  { %v5182_v48 = vmul.f32 1.442695, %v5174_v46 }
 0x98f   :  { %v5155_v7 = vpop.xlane.xlu1 %5154 }
 0x990   :  { %v5175_v31 = vsub.f32 %v4679_v60, %v5155_v7 }
 0x992   :  { %v5184_v33 = vmul.f32 1.442695, %v5175_v31 }
 0x993   :  { %v5158_v35 = vpop.xlane.xlu0 %5157 }
 0x994   :  { %6868 = vpow2.f32 %v5184_v33  ;;  %v5176_v16 = vsub.f32 %v4757_v32, %v5158_v35 }
 0x996   :  { %v5186_v21 = vmul.f32 1.442695, %v5176_v16 }
 0x997   :  { %v5161_v36 = vpop.xlane.xlu0 %5160 }
 0x998   :  { %v5177_v18 = vsub.f32 %v4835_v44, %v5161_v36 }
 0x99a   :  { %v5188_v39 = vmul.f32 1.442695, %v5177_v18 }
 0x99b   :  { %v5167_v38 = vpop.xlane.xlu0 %5166 }
 0x99c   :  { %6870 = vpow2.f32 %v5188_v39  ;;  %v5179_v10 = vsub.f32 %v4991_v0, %v5167_v38 }
 0x99e   :  { %v6869_v41 = vpop.eup %6868  ;;  %v5192_v12 = vmul.f32 1.442695, %v5179_v10 }
 0x99f   :  { %v5173_v43 = vpop.xlane.xlu0 %5172  ;;  %v5201_v45 = vsel %vm181_vm2, %v6869_v41, 0.0 }
 0x9a0   :  { %6872 = vpow2.f32 %v5192_v12  ;;  %v5181_v47 = vsub.f32 %v5147_v13, %v5173_v43  ;;  %5202 = vadd.xlane.f32.xlu0 %v5201_v45 }
 0x9a2   :  { %v5196_v49 = vmul.f32 1.442695, %v5181_v47 }
 0x9a4   :  { %6874 = vpow2.f32 %v5196_v49  ;;  %v177_v49 = vld [vmem:[%s7873_s4 + $0x18] sm:$0xff] }
 0x9a5   :  { %6876 = vpow2.f32 %v5182_v48 }
 0x9a6   :  { %v7769_v51 = vpop.eup %6870  ;;  %6878 = vpow2.f32 %v5186_v21 }
 0x9a7   :  { %v5207_v54 = vsel %vm181_vm2, %v7769_v51, 0.0 }
 0x9a8   :  { %5208 = vadd.xlane.f32.xlu0 %v5207_v54 }
 0x9aa   :  { %v7773_v4 = vpop.eup %6872 }
 0x9ab   :  { %v5213_v42 = vsel %vm181_vm2, %v7773_v4, 0.0 }
 0x9ac   :  { %5214 = vadd.xlane.f32.xlu0 %v5213_v42 }
 0x9ae   :  { %v7777_v14 = vpop.eup %6874 }
 0x9af   :  { %v5219_v19 = vsel %vm181_vm2, %v7777_v14, 0.0 }
 0x9b0   :  { %5220 = vadd.xlane.f32.xlu0 %v5219_v19 }
 0x9c6   :  { %5314 = vrot.lane.b32.xlu0 %v7025_v22, %s6936_s8 }
 0x9ca   :  { %5542 = vrot.lane.b32.xlu0 %v7035_v26, %s6936_s8  ;;  %v6877_v26 = vpop.eup %6876 }
 0x9cb   :  { %v5198_v57 = vsel %vm181_vm2, %v6877_v26, 0.0  ;;  %v6879_v59 = vpop.eup %6878 }
 0x9ce   :  { %v4912_v20 = vpop.f32.mrb[48].mxu0  ;;  %5694 = vrot.lane.b32.xlu0 %v7043_v28, %s6936_s8  ;;  %v5204_v28 = vsel %vm181_vm2, %v6879_v59, 0.0 }
 0x9cf   :  { %v4913_v50 = vadd.f32 %v4912_v20, %v7100_v40  ;;  %v6656_v30 = vpop.f32.mrb[49].mxu0 }
 0x9d1   :  { %v5162_v55 = vsel %vm181_vm2, %v4913_v50, -inf }
 0x9d2   :  { %5163 = vmax.xlane.f32.xlu1 %v5162_v55  ;;  %v5068_v52 = vpop.f32.mrb[50].mxu0 }
 0x9d3   :  { %v5069_v22 = vadd.f32 %v5068_v52, %v7100_v40  ;;  %v6666_v34 = vpop.f32.mrb[51].mxu0 }
 0x9d5   :  { %v5168_v56 = vsel %vm181_vm2, %v5069_v22, -inf }
 0x9d6   :  { %5169 = vmax.xlane.f32.xlu1 %v5168_v56  ;;  %v6159_v56 = vld [vmem:[%s7874_s5] ss:$0 sm:$0xff]  ;;  %s6937_s5 = smov [#allocation2]  }
 0x9d7   :  { %s6011_s12 = sshll.u32 %s6937_s5, 4  ;;  %s6012_s12 = int_to_ptr.vmem [resolvable:$true] %s6011_s12 }
 0x9d8   :  { %s6900_s13 = scalar_lea.vmem %s6012_s12, 1024  ;;  %p6905_p1 = scmp.lt.s32.totalorder %s6012_s12, %s6012_s12 }
 0x9d9   :  { %p6901_p0 = scmp.ne.s32.totalorder %s6012_s12, %s6900_s13  ;;  %p6906_p2 = scmp.lt.s32.totalorder %s6900_s13, %s6900_s13 }
 0x9da   :  { %5199 = vadd.xlane.f32.xlu1 %v5198_v57 }
 0x9db   :  { %p6907_p3 = por %p6906_p2, %p6905_p1 }
 0x9dd   :  { %p6908_p4 = pnand %p6907_p3, %p6901_p0 }
 0x9de   :  { %5205 = vadd.xlane.f32.xlu1 %v5204_v28 }
 0x9ef   :  { %5238 = vrot.lane.b32.xlu1 %v7022_v17, %s6936_s8 }
 0x9f3   :  { %5390 = vrot.lane.b32.xlu1 %v7027_v23, %s6936_s8 }
 0x9f7   :  { %5466 = vrot.lane.b32.xlu1 %v7029_v24, %s6936_s8 }
 0x9fb   :  { %5618 = vrot.lane.b32.xlu1 %v7033_v25, %s6936_s8 }
 0xa2d   :  { %v5203_v40 = vpop.xlane.xlu0 %5202 }
 0xa2e   :  { %6880 = vrcp.f32 %v5203_v40 }
 0xa35   :  { %v5209_v60 = vpop.xlane.xlu0 %5208 }
 0xa38   :  { %v6881_v2 = vpop.eup %6880 }
 0xa39   :  { %v5215_v62 = vpop.xlane.xlu0 %5214  ;;  %v5231_v32 = vmul.f32 %v6881_v2, %v6869_v41 }
 0xa3d   :  { %v5221_v63 = vpop.xlane.xlu0 %5220 }
 0xa41   :  { %v5315_v37 = vpop.permute.xlu0 %5314 }
 0xa42   :  { %6678 = vmatpush3.msra.mxu1 %v5315_v37 }
 0xa43   :  { %6680 = vmatmul.mubr.msk.f32.vlgmr.msra.gmra.mrb[76].mxu1 %vm181_vm2, %v5231_v32  ;;  %6687 = vmatprep.subr.mxu1 %v6924_v11 }
 0xa44   :  { %6689 = vmatprep.mubr.msk.f32.mxu1 %vm6925_vm1, %v6924_v11 }
 0xa45   :  { %v5543_v36 = vpop.permute.xlu0 %5542 }
 0xa5f   :  { %v5164_v17 = vpop.xlane.xlu1 %5163 }
 0xa60   :  { %v5178_v23 = vsub.f32 %v4913_v50, %v5164_v17 }
 0xa62   :  { %v5190_v24 = vmul.f32 1.442695, %v5178_v23 }
 0xa63   :  { %v5170_v25 = vpop.xlane.xlu1 %5169 }
 0xa64   :  { %6882 = vpow2.f32 %v5190_v24  ;;  %v5180_v3 = vsub.f32 %v5069_v22, %v5170_v25 }
 0xa66   :  { %v5194_v5 = vmul.f32 1.442695, %v5180_v3 }
 0xa67   :  { %v5200_v44 = vpop.xlane.xlu1 %5199 }
 0xa68   :  { %6884 = vpow2.f32 %v5194_v5 }
 0xa69   :  { %6886 = vrcp.f32 %v5200_v44 }
 0xa6a   :  { %6888 = vrcp.f32 %v5209_v60 }
 0xa6b   :  { %v5206_v6 = vpop.xlane.xlu1 %5205 }
 0xa6c   :  { %6890 = vrcp.f32 %v5206_v6 }
 0xa6d   :  { %6892 = vrcp.f32 %v5215_v62 }
 0xa6e   :  { %v6883_v53 = vpop.eup %6882  ;;  %6894 = vrcp.f32 %v5221_v63 }
 0xa6f   :  { %v5239_v9 = vpop.permute.xlu1 %5238  ;;  %v5210_v0 = vsel %vm181_vm2, %v6883_v53, 0.0 }
 0xa70   :  { %5211 = vadd.xlane.f32.xlu1 %v5210_v0  ;;  %6673 = vmatpush3.msra.mxu0 %v5239_v9 }
 0xa71   :  { %6682 = vmatprep.subr.mxu0 %v6924_v11 }
 0xa72   :  { %v6885_v8 = vpop.eup %6884 }
 0xa73   :  { %v6887_v1 = vpop.eup %6886  ;;  %v5391_v61 = vpop.permute.xlu1 %5390  ;;  %v5216_v13 = vsel %vm181_vm2, %v6885_v8, 0.0 }
 0xa74   :  { %v6889_v15 = vpop.eup %6888  ;;  %v5230_v29 = vmul.f32 %v6887_v1, %v6877_v26  ;;  %5217 = vadd.xlane.f32.xlu1 %v5216_v13 }
 0xa75   :  { %v5233_v7 = vmul.f32 %v6889_v15, %v7769_v51  ;;  %v5695_v51 = vpop.permute.xlu0 %5694 }
 0xa76   :  { %v6891_v58 = vpop.eup %6890  ;;  %6675 = vmatmul.mubr.msk.f32.vlgmr.msra.gmra.mrb[52].mxu0 %vm181_vm2, %v5230_v29 }
 0xa77   :  { %v5232_v31 = vmul.f32 %v6891_v58, %v6879_v59  ;;  %6683 = vmatpush3.msra.mxu0 %v5391_v61  ;;  %v5467_v33 = vpop.permute.xlu1 %5466  ;;  %6684 = vmatprep.mubr.msk.f32.mxu0 %vm6925_vm1, %v6924_v11  ;;  %v6893_v35 = vpop.eup %6892 }
 0xa78   :  { %6688 = vmatpush3.msra.mxu1 %v5467_v33  ;;  %6692 = vmatprep.subr.mxu0 %v6924_v11  ;;  %v5235_v18 = vmul.f32 %v6893_v35, %v7773_v4  ;;  %v6895_v41 = vpop.eup %6894 }
 0xa79   :  { %6690 = vmatmul.mubr.msk.f32.vlgmr.msra.gmra.mrb[78].mxu1 %vm181_vm2, %v5233_v7  ;;  %6697 = vmatprep.subr.mxu1 %v6924_v11  ;;  %v5237_v12 = vmul.f32 %v6895_v41, %v7777_v14 }
 0xa7a   :  { %6685 = vmatmul.mubr.msk.f32.vlgmr.msra.gmra.mrb[54].mxu0 %vm181_vm2, %v5232_v31  ;;  %6699 = vmatprep.mubr.msk.f32.mxu1 %vm6925_vm1, %v6924_v11 }
 0xa7b   :  { %6693 = vmatpush3.msra.mxu0 %v5543_v36  ;;  %v5619_v39 = vpop.permute.xlu1 %5618  ;;  %6694 = vmatprep.mubr.msk.f32.mxu0 %vm6925_vm1, %v6924_v11 }
 0xa7c   :  { %6698 = vmatpush3.msra.mxu1 %v5619_v39  ;;  %6702 = vmatprep.subr.mxu0 %v6924_v11 }
 0xa7d   :  { %6700 = vmatmul.mubr.msk.f32.vlgmr.msra.gmra.mrb[80].mxu1 %vm181_vm2, %v5235_v18  ;;  %6707 = vmatprep.subr.mxu1 %v6924_v11 }
 0xa7e   :  { %6709 = vmatprep.mubr.msk.f32.mxu1 %vm6925_vm1, %v6924_v11 }
 0xa85   :  { %5770 = vrot.lane.b32.xlu1 %v7039_v27, %s6936_s8 }
 0xafd   :  { %v5212_v38 = vpop.xlane.xlu1 %5211 }
 0xafe   :  { %6896 = vrcp.f32 %v5212_v38 }
 0xb01   :  { %v5218_v10 = vpop.xlane.xlu1 %5217 }
 0xb02   :  { %6898 = vrcp.f32 %v5218_v10 }
 0xb05   :  { %v5771_v43 = vpop.permute.xlu1 %5770 }
 0xb06   :  { %6708 = vmatpush3.msra.mxu1 %v5771_v43 }
 0xb07   :  { %6710 = vmatmul.mubr.msk.f32.vlgmr.msra.gmra.mrb[82].mxu1 %vm181_vm2, %v5237_v12 }
 0xb08   :  { %v6897_v45 = vpop.eup %6896 }
 0xb09   :  { %v5234_v47 = vmul.f32 %v6897_v45, %v6883_v53 }
 0xb0b   :  { %6695 = vmatmul.mubr.msk.f32.vlgmr.msra.gmra.mrb[56].mxu0 %vm181_vm2, %v5234_v47 }
 0xb0c   :  { %v6899_v27 = vpop.eup %6898  ;;  %6703 = vmatpush3.msra.mxu0 %v5695_v51  ;;  %6704 = vmatprep.mubr.msk.f32.mxu0 %vm6925_vm1, %v6924_v11 }
 0xb0d   :  { %v5236_v54 = vmul.f32 %v6899_v27, %v6885_v8  ;;  %6712 = vmatprep.subr.mxu0 %v177_v49 }
 0xb0f   :  { %6705 = vmatmul.mubr.msk.f32.vlgmr.msra.gmra.mrb[58].mxu0 %vm181_vm2, %v5236_v54 }
 0xb10   :  { %6713 = vmatpush3.msra.mxu0 %v177_v49 }
 0xb16   :  { %v5386_v4 = vpop.f32.mrb[76].mxu1 }
 0xb17   :  { %v6681_v42 = vpop.f32.mrb[77].mxu1 }
 0xb49   :  { %v5310_v14 = vpop.f32.mrb[52].mxu0 }
 0xb4a   :  { %v6676_v19 = vpop.f32.mrb[53].mxu0  ;;  %6714 = vmatprep.mubr.msk.f32.mxu0 %vm181_vm2, %v5310_v14 }
 0xb4b   :  { %6715 = vmatmul.mubr.msk.f32.vlgmr.msra.gmra.mrb[32].mxu0 %vm181_vm2, %v5386_v4 }
 0xb4c   :  { %v5538_v46 = vpop.f32.mrb[78].mxu1 }
 0xb4d   :  { %v5462_v48 = vpop.f32.mrb[54].mxu0  ;;  %v6691_v16 = vpop.f32.mrb[79].mxu1 }
 0xb4e   :  { %v6686_v21 = vpop.f32.mrb[55].mxu0  ;;  %6717 = vmatprep.mubr.msk.f32.mxu0 %vm181_vm2, %v5462_v48 }
 0xb4f   :  { %6718 = vmatmul.mubr.msk.f32.gmra.mrb[34].mxu0 %vm181_vm2, %v5538_v46 }
 0xb50   :  { %v5690_v11 = vpop.f32.mrb[80].mxu1 }
 0xb51   :  { %v6701_v20 = vpop.f32.mrb[81].mxu1 }
 0xbda   :  { %v5842_v50 = vpop.f32.mrb[82].mxu1 }
 0xbdb   :  { %v6711_v30 = vpop.f32.mrb[83].mxu1 }
 0xbde   :  { %v5614_v55 = vpop.f32.mrb[56].mxu0 }
 0xbdf   :  { %v6696_v52 = vpop.f32.mrb[57].mxu0  ;;  %6720 = vmatprep.mubr.msk.f32.mxu0 %vm181_vm2, %v5614_v55 }
 0xbe0   :  { %6721 = vmatmul.mubr.msk.f32.gmra.mrb[36].mxu0 %vm181_vm2, %v5690_v11 }
 0xbe2   :  { %v5766_v22 = vpop.f32.mrb[58].mxu0 }
 0xbe3   :  { %v6706_v34 = vpop.f32.mrb[59].mxu0  ;;  %6723 = vmatprep.mubr.msk.f32.mxu0 %vm181_vm2, %v5766_v22 }
 0xbe4   :  { %6724 = vmatmul.mubr.msk.f32.gmra.mrb[38].mxu0 %vm181_vm2, %v5842_v50 }
 0xc1e   :  { %v6716_v26 = vpop.f32.mrb[32].mxu0 }
 0xc1f   :  { %v5991_v57 = vadd.f32 %v6716_v26, %v6159_v56  ;;  %v5936_v59 = vpop.f32.mrb[33].mxu0 }
 0xc20   :  { %v5990_v28 = vadd.f32 %v6159_v56, %v5936_v59 }
 0xc21   :  { %5999 = vst.msk [vmem:[#allocation2 + $0x8] sm:$0xff] %vm181_vm2, %v5991_v57 }
 0xc22   :  { %5998 = vst.msk [vmem:[#allocation2] sm:$0xff] %vm181_vm2, %v5990_v28  ;;  %v6719_v40 = vpop.f32.mrb[34].mxu0 }
 0xc23   :  { %v5993_v60 = vadd.f32 %v6719_v40, %v6159_v56  ;;  %v5946_v62 = vpop.f32.mrb[35].mxu0 }
 0xc24   :  { %v5992_v63 = vadd.f32 %v6159_v56, %v5946_v62 }
 0xc25   :  { %6001 = vst.msk [vmem:[#allocation2 + $0x18] sm:$0xff] %vm181_vm2, %v5993_v60 }
 0xc26   :  { %6000 = vst.msk [vmem:[#allocation2 + $0x10] sm:$0xff] %vm181_vm2, %v5992_v63 }
 0xcb3   :  { %v6722_v2 = vpop.f32.mrb[36].mxu0 }
 0xcb4   :  { %v5995_v32 = vadd.f32 %v6722_v2, %v6159_v56  ;;  %v5956_v37 = vpop.f32.mrb[37].mxu0 }
 0xcb5   :  { %v5994_v17 = vadd.f32 %v6159_v56, %v5956_v37 }
 0xcb6   :  { %6003 = vst.msk [vmem:[#allocation2 + $0x28] sm:$0xff] %vm181_vm2, %v5995_v32 }
 0xcb7   :  { %6002 = vst.msk [vmem:[#allocation2 + $0x20] sm:$0xff] %vm181_vm2, %v5994_v17  ;;  %v6725_v23 = vpop.f32.mrb[38].mxu0 }
 0xcb8   :  { %v5997_v24 = vadd.f32 %v6725_v23, %v6159_v56  ;;  %v5966_v25 = vpop.f32.mrb[39].mxu0 }
 0xcb9   :  { %v5996_v3 = vadd.f32 %v6159_v56, %v5966_v25 }
 0xcba   :  { %6005 = vst.msk [vmem:[#allocation2 + $0x38] sm:$0xff] %vm181_vm2, %v5997_v24 }
 0xcbb   :  { %6004 = vst.msk [vmem:[#allocation2 + $0x30] sm:$0xff] %vm181_vm2, %v5996_v3 }
 0xcbc   :  { %6911 = shalt.err (!%p6908_p4)
}
 0xcbd   :  { %s6912_s16 = scalar_lea.hbm %s7875_s6, 1024 }
 0xcbe   :  { %p6913_p5 = scmp.ne.s32.totalorder %s7875_s6, %s6912_s16  ;;  %p6916_p6 = scmp.lt.u32.totalorder %s6912_s16, %s7875_s6 }
 0xcc0   :  { %p6918_p7 = pnand %p6916_p6, %p6913_p5 }
 0xcc2   :  { %6921 = shalt.err (!%p6918_p7)
}
 0xcc3   :  { %s6938_s1 = smov 128   ;;  %s6939_s19 = smov 8  }
 0xcc4   :  { %6017 = dma.vmem_to_hbm [thread:$0]  %s6012_s12, 1024, %s7875_s6, [#allocation3], %s6938_s1, %s6938_s1, %s6939_s19  }
 0xcc5   :  { %6922 = dma.done.wait [#allocation3], 1024  }
 0xcc6   :  { %6923 = vsyncadd [#allocation3], 4294966272 }
 0xcc7   :  { %6021 = vsyncpa [#allocation3], 1 }

</bundles_post_ra>
